<compile_context>
chip_gen: v7x
topology: tpu7x:2x2x1
jax: 0.10.0
libtpu: 0.0.40
codegen_flags: <defaults>
</compile_context>

<pallas_src>
import functools

import jax
import jax.numpy as jnp
import numpy as np
from jax.experimental import pallas as pl
from jax.experimental.pallas import tpu as pltpu


def _light_spatial_attn_kernel(b_ref, x_ref, tapw_ref, o_ref, pad_ref, *,
                               C, W, K, HW, HWp):
    """One grid step over Nb images, spatial dims flattened into the lane axis.

    b_ref   : (1,)          SMEM  folded conv+BN bias
    x_ref   : (Nb, C, HW)   VMEM  lane-dense input block
    tapw_ref: (K*K, HWp)    VMEM  per-tap weights, boundary masks + 0.5 folded in
    o_ref   : (Nb, C, HW)   VMEM  output block
    pad_ref : (Nb, HWp)     VMEM  lane-aligned staging scratch (used iff HWp > HW)
    """
    P = K // 2
    Nb = x_ref.shape[0]
    x = x_ref[...]                                        # (Nb, C, HW)

    # Channel reduction (sublane axis). attn = mean + max = 2*(0.5*mean + 0.5*max);
    # the factor 2 cancels against the 0.5 folded into the tap weights.
    s = jnp.sum(x, axis=1, dtype=jnp.float32)             # f32 accumulation, single pass
    m = jnp.max(x, axis=1).astype(jnp.float32)
    attn = s * (1.0 / C) + m                              # (Nb, HW)

    # Lane-aligned view of the attention map so every tap shift below is a roll over a
    # 128-multiple lane dimension. Only the last partial lane tile is zeroed (aligned).
    if HWp == HW:
        a = attn
    else:
        tail = (HW // 128) * 128
        pad_ref[:, pl.ds(tail, HWp - tail)] = jnp.zeros((Nb, HWp - tail), jnp.float32)
        pad_ref[:, pl.ds(0, HW)] = attn
        a = pad_ref[...]                                  # (Nb, HWp)

    # KxK conv as K*K lane rolls of the resident attn map. Taps that fall outside the
    # image (vertically or horizontally) — including anything a circular roll wraps
    # around — are zeroed by the masks pre-folded into tapw.
    acc = jnp.full((Nb, HWp), b_ref[0], dtype=jnp.float32)
    t = 0
    for oy in range(-P, P + 1):
        for ox in range(-P, P + 1):
            delta = oy * W + ox
            shifted = a if delta == 0 else pltpu.roll(a, (-delta) % HWp, 1)
            acc = acc + shifted * tapw_ref[pl.ds(t, 1), :]
            t += 1

    # Overflow-safe sigmoid: clamp so exp never overflows, then EUP approximate
    # reciprocal + one Newton step (full f32 accuracy, no inf*0 NaN path).
    acc = jnp.clip(acc, -30.0, 30.0)
    den = 1.0 + jnp.exp(-acc)
    inv = pl.reciprocal(den, approx=True)
    gate_full = inv * (2.0 - den * inv)                   # (Nb, HWp)

    if HWp == HW:
        gate = gate_full
    else:
        pad_ref[...] = gate_full                          # scratch is free again; reuse
        gate = pad_ref[:, pl.ds(0, HW)]                   # (Nb, HW)

    o_ref[...] = (x * gate[:, None, :].astype(x.dtype)).astype(o_ref.dtype)


def _fold_tap_weights(w_folded, H, W, HWp):
    """(K*K, HWp) tap weights with the 0.5 scale and both boundary masks folded in."""
    K = int(w_folded.shape[0])
    P = K // 2
    HW = H * W
    pos = np.arange(HWp, dtype=np.int64)
    row, col = pos // W, pos % W
    in_img = pos < HW
    w = 0.5 * np.asarray(w_folded, np.float32)
    tapw = np.zeros((K * K, HWp), np.float32)
    t = 0
    for oy in range(-P, P + 1):
        for ox in range(-P, P + 1):
            ok = (in_img & (row + oy >= 0) & (row + oy < H)
                  & (col + ox >= 0) & (col + ox < W))
            tapw[t] = w[oy + P, ox + P] * ok
            t += 1
    return jnp.asarray(tapw)


def _vmem_capacity_bytes():
    try:
        return int(pltpu.get_tpu_info().vmem_capacity_bytes)
    except Exception:
        return 64 * 1024 * 1024          # conservative (v7x-sized) fallback


def light_spatial_attn(x, w_folded, b_folded):
    """x: (N, C, H, W); w_folded: (K, K) BN-folded conv weight; b_folded: (1,) bias."""
    N, C, H, W = x.shape
    K = int(w_folded.shape[0])
    assert K % 2 == 1
    HW = H * W
    HWp = ((HW + 127) // 128) * 128      # lane-aligned conv width

    x_flat = x.reshape(N, C, HW)         # lane-dense layout (free reshape)
    tapw = _fold_tap_weights(w_folded, H, W, HWp)

    # ---- per-generation block sizing + explicit VMEM limit --------------------------
    cap = _vmem_capacity_bytes()
    usable = min(cap // 2, 64 * 1024 * 1024)   # v7x -> 32 MiB scoped, v5e/v6e -> 64 MiB
    budget = int(usable * 0.85)
    item = x.dtype.itemsize
    c_pad = ((C + 7) // 8) * 8
    kk_pad = ((K * K + 7) // 8) * 8

    def vmem_need(nb):
        io = 4 * nb * c_pad * HWp * item        # x + out blocks, double-buffered
        tmp = 10 * nb * HWp * 4                 # f32 attn/acc/roll/gate temporaries
        return io + tmp + nb * HWp * 4 + 2 * kk_pad * HWp * 4

    Nb = 1
    for cand in range(1, N + 1):
        if vmem_need(cand) > budget:
            break
        Nb = cand
    if N >= 2:
        Nb = min(Nb, N // 2)                    # keep >= 2 grid steps (v7x megacore)
    Nb = max(Nb, 1)
    while N % Nb:
        Nb -= 1
    vmem_limit = max(usable, min(int(vmem_need(Nb) * 1.25), int(cap * 0.9)))

    kernel = functools.partial(_light_spatial_attn_kernel,
                               C=C, W=W, K=K, HW=HW, HWp=HWp)
    out_flat = pl.pallas_call(
        kernel,
        out_shape=jax.ShapeDtypeStruct((N, C, HW), x.dtype),
        grid=(N // Nb,),
        in_specs=[
            pl.BlockSpec(memory_space=pltpu.SMEM),             # folded conv+BN bias
            pl.BlockSpec((Nb, C, HW), lambda n: (n, 0, 0)),    # x, lane-dense
            pl.BlockSpec((K * K, HWp), lambda n: (0, 0)),      # tap weights, resident
        ],
        out_specs=pl.BlockSpec((Nb, C, HW), lambda n: (n, 0, 0)),
        scratch_shapes=[pltpu.VMEM((Nb, HWp), jnp.float32)],
        compiler_params=pltpu.CompilerParams(
            dimension_semantics=("parallel",),                 # independent batch steps
            vmem_limit_bytes=int(vmem_limit),
        ),
    )(b_folded, x_flat, tapw)
    return out_flat.reshape(N, C, H, W)


def _reference(x, w_folded, b_folded):
    K = w_folded.shape[0]
    attn = 0.5 * jnp.mean(x, axis=1, keepdims=True) + 0.5 * jnp.max(x, axis=1, keepdims=True)
    conv = jax.lax.conv_general_dilated(
        attn.astype(jnp.float32),
        w_folded.reshape(1, 1, K, K).astype(jnp.float32),
        window_strides=(1, 1),
        padding=[(K // 2, K // 2), (K // 2, K // 2)],
        dimension_numbers=("NCHW", "OIHW", "NCHW"),
    ) + b_folded[0]
    return x * jax.nn.sigmoid(conv)


if __name__ == "__main__":
    key = jax.random.PRNGKey(0)
    k1, k2, k3, k4 = jax.random.split(key, 4)

    def run_case(kx, kw, N, C, H, W, K=7, bias=None):
        x = jax.random.normal(kx, (N, C, H, W), dtype=jnp.float32)
        conv_w = jax.random.normal(kw, (K, K), dtype=jnp.float32) * 0.1
        # BatchNorm2d(1) with default inference stats: mean=0, var=1, gamma=1, beta=0.
        eps = 1e-5
        gamma, beta, mean, var = 1.0, 0.0, 0.0, 1.0
        scale = gamma / np.sqrt(var + eps)
        w_folded = (conv_w * scale).astype(jnp.float32)
        b0 = (beta - mean * scale) if bias is None else bias
        b_folded = jnp.asarray([b0], dtype=jnp.float32)

        out = jax.block_until_ready(light_spatial_attn(x, w_folded, b_folded))
        ref = _reference(x, w_folded, b_folded)
        # 1e-3 tolerance: gate uses the EUP approximate reciprocal (+1 Newton step).
        np.testing.assert_allclose(np.asarray(out), np.asarray(ref), rtol=1e-3, atol=1e-3)

    run_case(k1, k2, N=2, C=4, H=16, W=16)                 # HW already lane-aligned
    run_case(k3, k4, N=2, C=3, H=8, W=24)                  # HW=192: padded path + masks
    run_case(k1, k4, N=2, C=4, H=16, W=16, bias=-100.0)    # saturated sigmoid, no NaN
    print("KERNEL_OK")
</pallas_src>

<mosaic_0001>
module attributes {stable_mosaic.version = 11 : i64} {
  func.func @_light_spatial_attn_kernel(%arg0: i32, %arg1: memref<1xf32, #tpu.memory_space<smem>>, %arg2: memref<1x4x256xf32, #tpu.memory_space<vmem>>, %arg3: memref<49x256xf32, #tpu.memory_space<vmem>>, %arg4: memref<1x4x256xf32, #tpu.memory_space<vmem>>, %arg5: memref<1x256xf32, #tpu.memory_space<vmem>>) attributes {dimension_semantics = [#tpu.dimension_semantics<parallel>], iteration_bounds = array<i64: 2>, scalar_prefetch = 0 : i64, scratch_operands = 1 : i64, tpu.core_type = #tpu.core_type<tc>, window_params = [{transform_indices = @transform_0, window_bounds = array<i64: 1>}, {transform_indices = @transform_1, window_bounds = array<i64: 1, 4, 256>}, {pipeline_mode = #tpu.pipeline_mode<synchronous>, transform_indices = @transform_2, window_bounds = array<i64: 49, 256>}, {transform_indices = @transform_3, window_bounds = array<i64: 1, 4, 256>}]} {
    %c0 = arith.constant 0 : index
    %c0_0 = arith.constant 0 : index
    %c0_1 = arith.constant 0 : index
    %0 = vector.load %arg2[%c0, %c0_0, %c0_1] : memref<1x4x256xf32, #tpu.memory_space<vmem>>, vector<1x4x256xf32>
    %cst = arith.constant dense<0.000000e+00> : vector<1x256xf32>
    %1 = vector.multi_reduction <add>, %0, %cst [1] : vector<1x4x256xf32> to vector<1x256xf32>
    %cst_2 = arith.constant dense<0xFF800000> : vector<1x256xf32>
    %2 = vector.multi_reduction <maximumf>, %0, %cst_2 [1] : vector<1x4x256xf32> to vector<1x256xf32>
    %cst_3 = arith.constant 2.500000e-01 : f32
    %3 = vector.broadcast %cst_3 : f32 to vector<1x256xf32>
    %4 = arith.mulf %1, %3 : vector<1x256xf32>
    %5 = arith.addf %4, %2 : vector<1x256xf32>
    %c0_4 = arith.constant 0 : index
    %6 = memref.load %arg1[%c0_4] : memref<1xf32, #tpu.memory_space<smem>>
    %7 = vector.broadcast %6 : f32 to vector<1x256xf32>
    %c51_i32 = arith.constant 51 : i32
    %8 = tpu.dynamic_rotate %5 by %c51_i32 dim 1 : vector<1x256xf32>, i32 -> vector<1x256xf32>
    %c0_5 = arith.constant 0 : index
    %c0_6 = arith.constant 0 : index
    %9 = vector.load %arg3[%c0_5, %c0_6] : memref<49x256xf32, #tpu.memory_space<vmem>>, vector<1x256xf32>
    %10 = arith.mulf %8, %9 : vector<1x256xf32>
    %11 = arith.addf %7, %10 : vector<1x256xf32>
    %c50_i32 = arith.constant 50 : i32
    %12 = tpu.dynamic_rotate %5 by %c50_i32 dim 1 : vector<1x256xf32>, i32 -> vector<1x256xf32>
    %c1 = arith.constant 1 : index
    %c0_7 = arith.constant 0 : index
    %13 = vector.load %arg3[%c1, %c0_7] : memref<49x256xf32, #tpu.memory_space<vmem>>, vector<1x256xf32>
    %14 = arith.mulf %12, %13 : vector<1x256xf32>
    %15 = arith.addf %11, %14 : vector<1x256xf32>
    %c49_i32 = arith.constant 49 : i32
    %16 = tpu.dynamic_rotate %5 by %c49_i32 dim 1 : vector<1x256xf32>, i32 -> vector<1x256xf32>
    %c2 = arith.constant 2 : index
    %c0_8 = arith.constant 0 : index
    %17 = vector.load %arg3[%c2, %c0_8] : memref<49x256xf32, #tpu.memory_space<vmem>>, vector<1x256xf32>
    %18 = arith.mulf %16, %17 : vector<1x256xf32>
    %19 = arith.addf %15, %18 : vector<1x256xf32>
    %c48_i32 = arith.constant 48 : i32
    %20 = tpu.dynamic_rotate %5 by %c48_i32 dim 1 : vector<1x256xf32>, i32 -> vector<1x256xf32>
    %c3 = arith.constant 3 : index
    %c0_9 = arith.constant 0 : index
    %21 = vector.load %arg3[%c3, %c0_9] : memref<49x256xf32, #tpu.memory_space<vmem>>, vector<1x256xf32>
    %22 = arith.mulf %20, %21 : vector<1x256xf32>
    %23 = arith.addf %19, %22 : vector<1x256xf32>
    %c47_i32 = arith.constant 47 : i32
    %24 = tpu.dynamic_rotate %5 by %c47_i32 dim 1 : vector<1x256xf32>, i32 -> vector<1x256xf32>
    %c4 = arith.constant 4 : index
    %c0_10 = arith.constant 0 : index
    %25 = vector.load %arg3[%c4, %c0_10] : memref<49x256xf32, #tpu.memory_space<vmem>>, vector<1x256xf32>
    %26 = arith.mulf %24, %25 : vector<1x256xf32>
    %27 = arith.addf %23, %26 : vector<1x256xf32>
    %c46_i32 = arith.constant 46 : i32
    %28 = tpu.dynamic_rotate %5 by %c46_i32 dim 1 : vector<1x256xf32>, i32 -> vector<1x256xf32>
    %c5 = arith.constant 5 : index
    %c0_11 = arith.constant 0 : index
    %29 = vector.load %arg3[%c5, %c0_11] : memref<49x256xf32, #tpu.memory_space<vmem>>, vector<1x256xf32>
    %30 = arith.mulf %28, %29 : vector<1x256xf32>
    %31 = arith.addf %27, %30 : vector<1x256xf32>
    %c45_i32 = arith.constant 45 : i32
    %32 = tpu.dynamic_rotate %5 by %c45_i32 dim 1 : vector<1x256xf32>, i32 -> vector<1x256xf32>
    %c6 = arith.constant 6 : index
    %c0_12 = arith.constant 0 : index
    %33 = vector.load %arg3[%c6, %c0_12] : memref<49x256xf32, #tpu.memory_space<vmem>>, vector<1x256xf32>
    %34 = arith.mulf %32, %33 : vector<1x256xf32>
    %35 = arith.addf %31, %34 : vector<1x256xf32>
    %c35_i32 = arith.constant 35 : i32
    %36 = tpu.dynamic_rotate %5 by %c35_i32 dim 1 : vector<1x256xf32>, i32 -> vector<1x256xf32>
    %c7 = arith.constant 7 : index
    %c0_13 = arith.constant 0 : index
    %37 = vector.load %arg3[%c7, %c0_13] : memref<49x256xf32, #tpu.memory_space<vmem>>, vector<1x256xf32>
    %38 = arith.mulf %36, %37 : vector<1x256xf32>
    %39 = arith.addf %35, %38 : vector<1x256xf32>
    %c34_i32 = arith.constant 34 : i32
    %40 = tpu.dynamic_rotate %5 by %c34_i32 dim 1 : vector<1x256xf32>, i32 -> vector<1x256xf32>
    %c8 = arith.constant 8 : index
    %c0_14 = arith.constant 0 : index
    %41 = vector.load %arg3[%c8, %c0_14] : memref<49x256xf32, #tpu.memory_space<vmem>>, vector<1x256xf32>
    %42 = arith.mulf %40, %41 : vector<1x256xf32>
    %43 = arith.addf %39, %42 : vector<1x256xf32>
    %c33_i32 = arith.constant 33 : i32
    %44 = tpu.dynamic_rotate %5 by %c33_i32 dim 1 : vector<1x256xf32>, i32 -> vector<1x256xf32>
    %c9 = arith.constant 9 : index
    %c0_15 = arith.constant 0 : index
    %45 = vector.load %arg3[%c9, %c0_15] : memref<49x256xf32, #tpu.memory_space<vmem>>, vector<1x256xf32>
    %46 = arith.mulf %44, %45 : vector<1x256xf32>
    %47 = arith.addf %43, %46 : vector<1x256xf32>
    %c32_i32 = arith.constant 32 : i32
    %48 = tpu.dynamic_rotate %5 by %c32_i32 dim 1 : vector<1x256xf32>, i32 -> vector<1x256xf32>
    %c10 = arith.constant 10 : index
    %c0_16 = arith.constant 0 : index
    %49 = vector.load %arg3[%c10, %c0_16] : memref<49x256xf32, #tpu.memory_space<vmem>>, vector<1x256xf32>
    %50 = arith.mulf %48, %49 : vector<1x256xf32>
    %51 = arith.addf %47, %50 : vector<1x256xf32>
    %c31_i32 = arith.constant 31 : i32
    %52 = tpu.dynamic_rotate %5 by %c31_i32 dim 1 : vector<1x256xf32>, i32 -> vector<1x256xf32>
    %c11 = arith.constant 11 : index
    %c0_17 = arith.constant 0 : index
    %53 = vector.load %arg3[%c11, %c0_17] : memref<49x256xf32, #tpu.memory_space<vmem>>, vector<1x256xf32>
    %54 = arith.mulf %52, %53 : vector<1x256xf32>
    %55 = arith.addf %51, %54 : vector<1x256xf32>
    %c30_i32 = arith.constant 30 : i32
    %56 = tpu.dynamic_rotate %5 by %c30_i32 dim 1 : vector<1x256xf32>, i32 -> vector<1x256xf32>
    %c12 = arith.constant 12 : index
    %c0_18 = arith.constant 0 : index
    %57 = vector.load %arg3[%c12, %c0_18] : memref<49x256xf32, #tpu.memory_space<vmem>>, vector<1x256xf32>
    %58 = arith.mulf %56, %57 : vector<1x256xf32>
    %59 = arith.addf %55, %58 : vector<1x256xf32>
    %c29_i32 = arith.constant 29 : i32
    %60 = tpu.dynamic_rotate %5 by %c29_i32 dim 1 : vector<1x256xf32>, i32 -> vector<1x256xf32>
    %c13 = arith.constant 13 : index
    %c0_19 = arith.constant 0 : index
    %61 = vector.load %arg3[%c13, %c0_19] : memref<49x256xf32, #tpu.memory_space<vmem>>, vector<1x256xf32>
    %62 = arith.mulf %60, %61 : vector<1x256xf32>
    %63 = arith.addf %59, %62 : vector<1x256xf32>
    %c19_i32 = arith.constant 19 : i32
    %64 = tpu.dynamic_rotate %5 by %c19_i32 dim 1 : vector<1x256xf32>, i32 -> vector<1x256xf32>
    %c14 = arith.constant 14 : index
    %c0_20 = arith.constant 0 : index
    %65 = vector.load %arg3[%c14, %c0_20] : memref<49x256xf32, #tpu.memory_space<vmem>>, vector<1x256xf32>
    %66 = arith.mulf %64, %65 : vector<1x256xf32>
    %67 = arith.addf %63, %66 : vector<1x256xf32>
    %c18_i32 = arith.constant 18 : i32
    %68 = tpu.dynamic_rotate %5 by %c18_i32 dim 1 : vector<1x256xf32>, i32 -> vector<1x256xf32>
    %c15 = arith.constant 15 : index
    %c0_21 = arith.constant 0 : index
    %69 = vector.load %arg3[%c15, %c0_21] : memref<49x256xf32, #tpu.memory_space<vmem>>, vector<1x256xf32>
    %70 = arith.mulf %68, %69 : vector<1x256xf32>
    %71 = arith.addf %67, %70 : vector<1x256xf32>
    %c17_i32 = arith.constant 17 : i32
    %72 = tpu.dynamic_rotate %5 by %c17_i32 dim 1 : vector<1x256xf32>, i32 -> vector<1x256xf32>
    %c16 = arith.constant 16 : index
    %c0_22 = arith.constant 0 : index
    %73 = vector.load %arg3[%c16, %c0_22] : memref<49x256xf32, #tpu.memory_space<vmem>>, vector<1x256xf32>
    %74 = arith.mulf %72, %73 : vector<1x256xf32>
    %75 = arith.addf %71, %74 : vector<1x256xf32>
    %c16_i32 = arith.constant 16 : i32
    %76 = tpu.dynamic_rotate %5 by %c16_i32 dim 1 : vector<1x256xf32>, i32 -> vector<1x256xf32>
    %c17 = arith.constant 17 : index
    %c0_23 = arith.constant 0 : index
    %77 = vector.load %arg3[%c17, %c0_23] : memref<49x256xf32, #tpu.memory_space<vmem>>, vector<1x256xf32>
    %78 = arith.mulf %76, %77 : vector<1x256xf32>
    %79 = arith.addf %75, %78 : vector<1x256xf32>
    %c15_i32 = arith.constant 15 : i32
    %80 = tpu.dynamic_rotate %5 by %c15_i32 dim 1 : vector<1x256xf32>, i32 -> vector<1x256xf32>
    %c18 = arith.constant 18 : index
    %c0_24 = arith.constant 0 : index
    %81 = vector.load %arg3[%c18, %c0_24] : memref<49x256xf32, #tpu.memory_space<vmem>>, vector<1x256xf32>
    %82 = arith.mulf %80, %81 : vector<1x256xf32>
    %83 = arith.addf %79, %82 : vector<1x256xf32>
    %c14_i32 = arith.constant 14 : i32
    %84 = tpu.dynamic_rotate %5 by %c14_i32 dim 1 : vector<1x256xf32>, i32 -> vector<1x256xf32>
    %c19 = arith.constant 19 : index
    %c0_25 = arith.constant 0 : index
    %85 = vector.load %arg3[%c19, %c0_25] : memref<49x256xf32, #tpu.memory_space<vmem>>, vector<1x256xf32>
    %86 = arith.mulf %84, %85 : vector<1x256xf32>
    %87 = arith.addf %83, %86 : vector<1x256xf32>
    %c13_i32 = arith.constant 13 : i32
    %88 = tpu.dynamic_rotate %5 by %c13_i32 dim 1 : vector<1x256xf32>, i32 -> vector<1x256xf32>
    %c20 = arith.constant 20 : index
    %c0_26 = arith.constant 0 : index
    %89 = vector.load %arg3[%c20, %c0_26] : memref<49x256xf32, #tpu.memory_space<vmem>>, vector<1x256xf32>
    %90 = arith.mulf %88, %89 : vector<1x256xf32>
    %91 = arith.addf %87, %90 : vector<1x256xf32>
    %c3_i32 = arith.constant 3 : i32
    %92 = tpu.dynamic_rotate %5 by %c3_i32 dim 1 : vector<1x256xf32>, i32 -> vector<1x256xf32>
    %c21 = arith.constant 21 : index
    %c0_27 = arith.constant 0 : index
    %93 = vector.load %arg3[%c21, %c0_27] : memref<49x256xf32, #tpu.memory_space<vmem>>, vector<1x256xf32>
    %94 = arith.mulf %92, %93 : vector<1x256xf32>
    %95 = arith.addf %91, %94 : vector<1x256xf32>
    %c2_i32 = arith.constant 2 : i32
    %96 = tpu.dynamic_rotate %5 by %c2_i32 dim 1 : vector<1x256xf32>, i32 -> vector<1x256xf32>
    %c22 = arith.constant 22 : index
    %c0_28 = arith.constant 0 : index
    %97 = vector.load %arg3[%c22, %c0_28] : memref<49x256xf32, #tpu.memory_space<vmem>>, vector<1x256xf32>
    %98 = arith.mulf %96, %97 : vector<1x256xf32>
    %99 = arith.addf %95, %98 : vector<1x256xf32>
    %c1_i32 = arith.constant 1 : i32
    %100 = tpu.dynamic_rotate %5 by %c1_i32 dim 1 : vector<1x256xf32>, i32 -> vector<1x256xf32>
    %c23 = arith.constant 23 : index
    %c0_29 = arith.constant 0 : index
    %101 = vector.load %arg3[%c23, %c0_29] : memref<49x256xf32, #tpu.memory_space<vmem>>, vector<1x256xf32>
    %102 = arith.mulf %100, %101 : vector<1x256xf32>
    %103 = arith.addf %99, %102 : vector<1x256xf32>
    %c24 = arith.constant 24 : index
    %c0_30 = arith.constant 0 : index
    %104 = vector.load %arg3[%c24, %c0_30] : memref<49x256xf32, #tpu.memory_space<vmem>>, vector<1x256xf32>
    %105 = arith.mulf %5, %104 : vector<1x256xf32>
    %106 = arith.addf %103, %105 : vector<1x256xf32>
    %c255_i32 = arith.constant 255 : i32
    %107 = tpu.dynamic_rotate %5 by %c255_i32 dim 1 : vector<1x256xf32>, i32 -> vector<1x256xf32>
    %c25 = arith.constant 25 : index
    %c0_31 = arith.constant 0 : index
    %108 = vector.load %arg3[%c25, %c0_31] : memref<49x256xf32, #tpu.memory_space<vmem>>, vector<1x256xf32>
    %109 = arith.mulf %107, %108 : vector<1x256xf32>
    %110 = arith.addf %106, %109 : vector<1x256xf32>
    %c254_i32 = arith.constant 254 : i32
    %111 = tpu.dynamic_rotate %5 by %c254_i32 dim 1 : vector<1x256xf32>, i32 -> vector<1x256xf32>
    %c26 = arith.constant 26 : index
    %c0_32 = arith.constant 0 : index
    %112 = vector.load %arg3[%c26, %c0_32] : memref<49x256xf32, #tpu.memory_space<vmem>>, vector<1x256xf32>
    %113 = arith.mulf %111, %112 : vector<1x256xf32>
    %114 = arith.addf %110, %113 : vector<1x256xf32>
    %c253_i32 = arith.constant 253 : i32
    %115 = tpu.dynamic_rotate %5 by %c253_i32 dim 1 : vector<1x256xf32>, i32 -> vector<1x256xf32>
    %c27 = arith.constant 27 : index
    %c0_33 = arith.constant 0 : index
    %116 = vector.load %arg3[%c27, %c0_33] : memref<49x256xf32, #tpu.memory_space<vmem>>, vector<1x256xf32>
    %117 = arith.mulf %115, %116 : vector<1x256xf32>
    %118 = arith.addf %114, %117 : vector<1x256xf32>
    %c243_i32 = arith.constant 243 : i32
    %119 = tpu.dynamic_rotate %5 by %c243_i32 dim 1 : vector<1x256xf32>, i32 -> vector<1x256xf32>
    %c28 = arith.constant 28 : index
    %c0_34 = arith.constant 0 : index
    %120 = vector.load %arg3[%c28, %c0_34] : memref<49x256xf32, #tpu.memory_space<vmem>>, vector<1x256xf32>
    %121 = arith.mulf %119, %120 : vector<1x256xf32>
    %122 = arith.addf %118, %121 : vector<1x256xf32>
    %c242_i32 = arith.constant 242 : i32
    %123 = tpu.dynamic_rotate %5 by %c242_i32 dim 1 : vector<1x256xf32>, i32 -> vector<1x256xf32>
    %c29 = arith.constant 29 : index
    %c0_35 = arith.constant 0 : index
    %124 = vector.load %arg3[%c29, %c0_35] : memref<49x256xf32, #tpu.memory_space<vmem>>, vector<1x256xf32>
    %125 = arith.mulf %123, %124 : vector<1x256xf32>
    %126 = arith.addf %122, %125 : vector<1x256xf32>
    %c241_i32 = arith.constant 241 : i32
    %127 = tpu.dynamic_rotate %5 by %c241_i32 dim 1 : vector<1x256xf32>, i32 -> vector<1x256xf32>
    %c30 = arith.constant 30 : index
    %c0_36 = arith.constant 0 : index
    %128 = vector.load %arg3[%c30, %c0_36] : memref<49x256xf32, #tpu.memory_space<vmem>>, vector<1x256xf32>
    %129 = arith.mulf %127, %128 : vector<1x256xf32>
    %130 = arith.addf %126, %129 : vector<1x256xf32>
    %c240_i32 = arith.constant 240 : i32
    %131 = tpu.dynamic_rotate %5 by %c240_i32 dim 1 : vector<1x256xf32>, i32 -> vector<1x256xf32>
    %c31 = arith.constant 31 : index
    %c0_37 = arith.constant 0 : index
    %132 = vector.load %arg3[%c31, %c0_37] : memref<49x256xf32, #tpu.memory_space<vmem>>, vector<1x256xf32>
    %133 = arith.mulf %131, %132 : vector<1x256xf32>
    %134 = arith.addf %130, %133 : vector<1x256xf32>
    %c239_i32 = arith.constant 239 : i32
    %135 = tpu.dynamic_rotate %5 by %c239_i32 dim 1 : vector<1x256xf32>, i32 -> vector<1x256xf32>
    %c32 = arith.constant 32 : index
    %c0_38 = arith.constant 0 : index
    %136 = vector.load %arg3[%c32, %c0_38] : memref<49x256xf32, #tpu.memory_space<vmem>>, vector<1x256xf32>
    %137 = arith.mulf %135, %136 : vector<1x256xf32>
    %138 = arith.addf %134, %137 : vector<1x256xf32>
    %c238_i32 = arith.constant 238 : i32
    %139 = tpu.dynamic_rotate %5 by %c238_i32 dim 1 : vector<1x256xf32>, i32 -> vector<1x256xf32>
    %c33 = arith.constant 33 : index
    %c0_39 = arith.constant 0 : index
    %140 = vector.load %arg3[%c33, %c0_39] : memref<49x256xf32, #tpu.memory_space<vmem>>, vector<1x256xf32>
    %141 = arith.mulf %139, %140 : vector<1x256xf32>
    %142 = arith.addf %138, %141 : vector<1x256xf32>
    %c237_i32 = arith.constant 237 : i32
    %143 = tpu.dynamic_rotate %5 by %c237_i32 dim 1 : vector<1x256xf32>, i32 -> vector<1x256xf32>
    %c34 = arith.constant 34 : index
    %c0_40 = arith.constant 0 : index
    %144 = vector.load %arg3[%c34, %c0_40] : memref<49x256xf32, #tpu.memory_space<vmem>>, vector<1x256xf32>
    %145 = arith.mulf %143, %144 : vector<1x256xf32>
    %146 = arith.addf %142, %145 : vector<1x256xf32>
    %c227_i32 = arith.constant 227 : i32
    %147 = tpu.dynamic_rotate %5 by %c227_i32 dim 1 : vector<1x256xf32>, i32 -> vector<1x256xf32>
    %c35 = arith.constant 35 : index
    %c0_41 = arith.constant 0 : index
    %148 = vector.load %arg3[%c35, %c0_41] : memref<49x256xf32, #tpu.memory_space<vmem>>, vector<1x256xf32>
    %149 = arith.mulf %147, %148 : vector<1x256xf32>
    %150 = arith.addf %146, %149 : vector<1x256xf32>
    %c226_i32 = arith.constant 226 : i32
    %151 = tpu.dynamic_rotate %5 by %c226_i32 dim 1 : vector<1x256xf32>, i32 -> vector<1x256xf32>
    %c36 = arith.constant 36 : index
    %c0_42 = arith.constant 0 : index
    %152 = vector.load %arg3[%c36, %c0_42] : memref<49x256xf32, #tpu.memory_space<vmem>>, vector<1x256xf32>
    %153 = arith.mulf %151, %152 : vector<1x256xf32>
    %154 = arith.addf %150, %153 : vector<1x256xf32>
    %c225_i32 = arith.constant 225 : i32
    %155 = tpu.dynamic_rotate %5 by %c225_i32 dim 1 : vector<1x256xf32>, i32 -> vector<1x256xf32>
    %c37 = arith.constant 37 : index
    %c0_43 = arith.constant 0 : index
    %156 = vector.load %arg3[%c37, %c0_43] : memref<49x256xf32, #tpu.memory_space<vmem>>, vector<1x256xf32>
    %157 = arith.mulf %155, %156 : vector<1x256xf32>
    %158 = arith.addf %154, %157 : vector<1x256xf32>
    %c224_i32 = arith.constant 224 : i32
    %159 = tpu.dynamic_rotate %5 by %c224_i32 dim 1 : vector<1x256xf32>, i32 -> vector<1x256xf32>
    %c38 = arith.constant 38 : index
    %c0_44 = arith.constant 0 : index
    %160 = vector.load %arg3[%c38, %c0_44] : memref<49x256xf32, #tpu.memory_space<vmem>>, vector<1x256xf32>
    %161 = arith.mulf %159, %160 : vector<1x256xf32>
    %162 = arith.addf %158, %161 : vector<1x256xf32>
    %c223_i32 = arith.constant 223 : i32
    %163 = tpu.dynamic_rotate %5 by %c223_i32 dim 1 : vector<1x256xf32>, i32 -> vector<1x256xf32>
    %c39 = arith.constant 39 : index
    %c0_45 = arith.constant 0 : index
    %164 = vector.load %arg3[%c39, %c0_45] : memref<49x256xf32, #tpu.memory_space<vmem>>, vector<1x256xf32>
    %165 = arith.mulf %163, %164 : vector<1x256xf32>
    %166 = arith.addf %162, %165 : vector<1x256xf32>
    %c222_i32 = arith.constant 222 : i32
    %167 = tpu.dynamic_rotate %5 by %c222_i32 dim 1 : vector<1x256xf32>, i32 -> vector<1x256xf32>
    %c40 = arith.constant 40 : index
    %c0_46 = arith.constant 0 : index
    %168 = vector.load %arg3[%c40, %c0_46] : memref<49x256xf32, #tpu.memory_space<vmem>>, vector<1x256xf32>
    %169 = arith.mulf %167, %168 : vector<1x256xf32>
    %170 = arith.addf %166, %169 : vector<1x256xf32>
    %c221_i32 = arith.constant 221 : i32
    %171 = tpu.dynamic_rotate %5 by %c221_i32 dim 1 : vector<1x256xf32>, i32 -> vector<1x256xf32>
    %c41 = arith.constant 41 : index
    %c0_47 = arith.constant 0 : index
    %172 = vector.load %arg3[%c41, %c0_47] : memref<49x256xf32, #tpu.memory_space<vmem>>, vector<1x256xf32>
    %173 = arith.mulf %171, %172 : vector<1x256xf32>
    %174 = arith.addf %170, %173 : vector<1x256xf32>
    %c211_i32 = arith.constant 211 : i32
    %175 = tpu.dynamic_rotate %5 by %c211_i32 dim 1 : vector<1x256xf32>, i32 -> vector<1x256xf32>
    %c42 = arith.constant 42 : index
    %c0_48 = arith.constant 0 : index
    %176 = vector.load %arg3[%c42, %c0_48] : memref<49x256xf32, #tpu.memory_space<vmem>>, vector<1x256xf32>
    %177 = arith.mulf %175, %176 : vector<1x256xf32>
    %178 = arith.addf %174, %177 : vector<1x256xf32>
    %c210_i32 = arith.constant 210 : i32
    %179 = tpu.dynamic_rotate %5 by %c210_i32 dim 1 : vector<1x256xf32>, i32 -> vector<1x256xf32>
    %c43 = arith.constant 43 : index
    %c0_49 = arith.constant 0 : index
    %180 = vector.load %arg3[%c43, %c0_49] : memref<49x256xf32, #tpu.memory_space<vmem>>, vector<1x256xf32>
    %181 = arith.mulf %179, %180 : vector<1x256xf32>
    %182 = arith.addf %178, %181 : vector<1x256xf32>
    %c209_i32 = arith.constant 209 : i32
    %183 = tpu.dynamic_rotate %5 by %c209_i32 dim 1 : vector<1x256xf32>, i32 -> vector<1x256xf32>
    %c44 = arith.constant 44 : index
    %c0_50 = arith.constant 0 : index
    %184 = vector.load %arg3[%c44, %c0_50] : memref<49x256xf32, #tpu.memory_space<vmem>>, vector<1x256xf32>
    %185 = arith.mulf %183, %184 : vector<1x256xf32>
    %186 = arith.addf %182, %185 : vector<1x256xf32>
    %c208_i32 = arith.constant 208 : i32
    %187 = tpu.dynamic_rotate %5 by %c208_i32 dim 1 : vector<1x256xf32>, i32 -> vector<1x256xf32>
    %c45 = arith.constant 45 : index
    %c0_51 = arith.constant 0 : index
    %188 = vector.load %arg3[%c45, %c0_51] : memref<49x256xf32, #tpu.memory_space<vmem>>, vector<1x256xf32>
    %189 = arith.mulf %187, %188 : vector<1x256xf32>
    %190 = arith.addf %186, %189 : vector<1x256xf32>
    %c207_i32 = arith.constant 207 : i32
    %191 = tpu.dynamic_rotate %5 by %c207_i32 dim 1 : vector<1x256xf32>, i32 -> vector<1x256xf32>
    %c46 = arith.constant 46 : index
    %c0_52 = arith.constant 0 : index
    %192 = vector.load %arg3[%c46, %c0_52] : memref<49x256xf32, #tpu.memory_space<vmem>>, vector<1x256xf32>
    %193 = arith.mulf %191, %192 : vector<1x256xf32>
    %194 = arith.addf %190, %193 : vector<1x256xf32>
    %c206_i32 = arith.constant 206 : i32
    %195 = tpu.dynamic_rotate %5 by %c206_i32 dim 1 : vector<1x256xf32>, i32 -> vector<1x256xf32>
    %c47 = arith.constant 47 : index
    %c0_53 = arith.constant 0 : index
    %196 = vector.load %arg3[%c47, %c0_53] : memref<49x256xf32, #tpu.memory_space<vmem>>, vector<1x256xf32>
    %197 = arith.mulf %195, %196 : vector<1x256xf32>
    %198 = arith.addf %194, %197 : vector<1x256xf32>
    %c205_i32 = arith.constant 205 : i32
    %199 = tpu.dynamic_rotate %5 by %c205_i32 dim 1 : vector<1x256xf32>, i32 -> vector<1x256xf32>
    %c48 = arith.constant 48 : index
    %c0_54 = arith.constant 0 : index
    %200 = vector.load %arg3[%c48, %c0_54] : memref<49x256xf32, #tpu.memory_space<vmem>>, vector<1x256xf32>
    %201 = arith.mulf %199, %200 : vector<1x256xf32>
    %202 = arith.addf %198, %201 : vector<1x256xf32>
    %cst_55 = arith.constant -3.000000e+01 : f32
    %cst_56 = arith.constant 3.000000e+01 : f32
    %203 = vector.broadcast %cst_55 : f32 to vector<1x256xf32>
    %204 = arith.maximumf %203, %202 : vector<1x256xf32>
    %205 = vector.broadcast %cst_56 : f32 to vector<1x256xf32>
    %206 = arith.minimumf %205, %204 : vector<1x256xf32>
    %cst_57 = arith.constant 0.000000e+00 : f32
    %207 = vector.broadcast %cst_57 : f32 to vector<1x256xf32>
    %208 = arith.subf %207, %206 : vector<1x256xf32>
    %209 = math.exp %208 : vector<1x256xf32>
    %cst_58 = arith.constant 1.000000e+00 : f32
    %210 = vector.broadcast %cst_58 : f32 to vector<1x256xf32>
    %211 = arith.addf %210, %209 : vector<1x256xf32>
    %212 = tpu.reciprocal %211 {approx = true} : vector<1x256xf32> -> vector<1x256xf32>
    %213 = arith.mulf %211, %212 : vector<1x256xf32>
    %cst_59 = arith.constant 2.000000e+00 : f32
    %214 = vector.broadcast %cst_59 : f32 to vector<1x256xf32>
    %215 = arith.subf %214, %213 : vector<1x256xf32>
    %216 = arith.mulf %212, %215 : vector<1x256xf32>
    %217 = vector.shape_cast %216 : vector<1x256xf32> to vector<1x1x256xf32>
    %218 = vector.broadcast %217 : vector<1x1x256xf32> to vector<1x4x256xf32>
    %219 = arith.mulf %0, %218 : vector<1x4x256xf32>
    %c0_60 = arith.constant 0 : index
    %c0_61 = arith.constant 0 : index
    %c0_62 = arith.constant 0 : index
    %220 = vector.load %arg4[%c0_60, %c0_61, %c0_62] : memref<1x4x256xf32, #tpu.memory_space<vmem>>, vector<1x4x256xf32>
    tpu.vector_store %arg4[%c0_60, %c0_61, %c0_62], %219 {strides = array<i32>} : memref<1x4x256xf32, #tpu.memory_space<vmem>>, vector<1x4x256xf32>,
    return
  }
  func.func @transform_0(%arg0: i32) -> i32 {
    %c0_i32 = arith.constant 0 : i32
    %c0_i32_0 = arith.constant 0 : i32
    return %c0_i32 : i32
  }
  func.func @transform_1(%arg0: i32) -> (i32, i32, i32) {
    %c0_i32 = arith.constant 0 : i32
    %c0_i32_0 = arith.constant 0 : i32
    %c0_i32_1 = arith.constant 0 : i32
    return %arg0, %c0_i32, %c0_i32_0 : i32, i32, i32
  }
  func.func @transform_2(%arg0: i32) -> (i32, i32) {
    %c0_i32 = arith.constant 0 : i32
    %c0_i32_0 = arith.constant 0 : i32
    %c0_i32_1 = arith.constant 0 : i32
    return %c0_i32, %c0_i32_0 : i32, i32
  }
  func.func @transform_3(%arg0: i32) -> (i32, i32, i32) {
    %c0_i32 = arith.constant 0 : i32
    %c0_i32_0 = arith.constant 0 : i32
    %c0_i32_1 = arith.constant 0 : i32
    return %arg0, %c0_i32, %c0_i32_0 : i32, i32, i32
  }
}

</mosaic_0001>

<bundles_post_ra>
// kernel: tpu_custom_call.1
= control target key start
LH: loop header
LB: loop body
LE: loop exit
PB: predicated region body
PF: predicated region fallthrough
CT: control target
= control target key end

     0   :  { %s2823_s0 = inlined_call_operand.<no memory space> [shape: f32[1], index: 0, kind: input, shape index: {}]   ;;  %s2824_s1 = inlined_call_operand.hbm [shape: f32[2,4,256], index: 1, kind: input, shape index: {}]   ;;  %s2825_s2 = inlined_call_operand.hbm [shape: f32[49,256], index: 2, kind: input, shape index: {}]   ;;  %s2826_s3 = inlined_call_operand.hbm [shape: f32[2,4,256], index: 3, kind: output, shape index: {}]  }
   0x1   :  { %8 = sst [smem:[#allocation3]] %s2823_s0 }
   0x2   :  { %9 = vsyncpa [#allocation5], 0 }
   0x3   :  { %11 = vsyncpa [#allocation5 + $0x1], 0 }
   0x4   :  { %12 = vsyncpa [#allocation8], 0 }
   0x5   :  { %13 = vsyncpa [#allocation6], 0 }
   0x6   :  { %15 = vsyncpa [#allocation6 + $0x1], 0  ;;  %s1884_s14 = smov 0   ;;  %s1886_s15 = smov 0  }
   0x7   :  { %s1888_s16 = smov 0   ;;  %s1890_s17 = smov 0  }
   0x8 LB: > { %s1905_s0 = sadd.s32 4294967295, %s1806_s17   ;;  %s1541_s18 = sadd.s32 4294967294, %s1806_s17   ;;  %s1806_s17 = sphi %s1890_s17, %s2846_s17   ;;  %s1802_s16 = sphi %s1888_s16, %s2845_s16   ;;  %s1798_s15 = sphi %s1886_s15, %s2844_s15   ;;  %s1794_s14 = sphi %s1884_s14, %s2843_s14  }
   0x9   : > { %p62_p0 = scmp.ne.s32.totalorder %s1798_s15, %s1794_s14  ;;  %p2827_p1 = scmp.eq.s32.totalorder %s1905_s0, 0 }
   0xa   : > { %p113_p3 = scmp.eq.s32.totalorder %s1541_s18, 1  ;;  %p1542_p5 = scmp.ge.s32.totalorder %s1806_s17, 1 }
   0xb   : > { %p1914_p4 = por %p2827_p1, %p62_p0  ;;  %p120_p7 = scmp.lt.s32.totalorder %s1806_s17, 3 }
   0xc   : > { %p1919_p6 = por %p113_p3, %p62_p0  ;;  %s1808_s22 = smov [#allocation7]  }
   0xd   : > { %s2830_s19 = scalar_select %p1914_p4, 1, 0 }
   0xe   : > { %s2831_s20 = scalar_select %p1919_p6, 1, 0 }
   0xf   : > { %p1924_p8 = pnand %p1542_p5, %p120_p7  ;;  %s135_s23 = sshll.u32 %s1808_s22, 4  ;;  %s1928_s23 = int_to_ptr.vmem [resolvable:$true] %s135_s23 }
  0x10   : > { %s1940_s25 = sadd.s32 1, %s1806_s17   ;;  %s49_s26 = sadd.s32 1, %s1802_s16 }
  0x11   : > { %s2832_s21 = scalar_select %p1924_p8, 1, 0 }
  0x12   : > { %p1569_p9 = pneg %p1924_p8  ;;  %s46_s27 = ssub.s32 %s1806_s17, %s1940_s25 }
  0x13   : > { %s1678_s30 = scalar_lea.hbm %s2825_s2, 1792 }
  0x14   : > { %p1935_p11 = pnand %p1569_p9, %p2827_p1  ;;  %p1679_p12 = scmp.ne.s32.totalorder %s2825_s2, %s1678_s30 }
  0x15   : > { %p1685_p5 = scmp.lt.u32.totalorder %s1678_s30, %s2825_s2 }
  0x16   : > { %p1680_p13 = pneg %p1935_p11 }
  0x18   : > { %p1681_p0 = pnand %p1680_p13, %p1679_p12 }
  0x1a   : > { %p1682_p3 = pneg %p1681_p0 }
  0x1c   : > { %p1687_p7 = pnand %p1685_p5, %p1682_p3 }
  0x1e   : > { %1690 = shalt.err (!%p1687_p7)
}
  0x1f   : > { %s1691_s8 = scalar_lea.vmem %s1928_s23, 1792  ;;  %p1699_p2 = scmp.lt.s32.totalorder %s1928_s23, %s1928_s23 }
  0x20   : > { %p1692_p9 = scmp.ne.s32.totalorder %s1928_s23, %s1691_s8  ;;  %p1700_p6 = scmp.lt.s32.totalorder %s1691_s8, %s1691_s8 }
  0x22   : > { %p1694_p10 = pnand %p1692_p9, %p1680_p13  ;;  %p1701_p4 = por %p1700_p6, %p1699_p2 }
  0x24   : > { %p1695_p1 = pneg %p1694_p10 }
  0x26   : > { %p1702_p8 = pnand %p1701_p4, %p1695_p1 }
  0x28   : > { %1705 = shalt.err (!%p1702_p8)
}
  0x29   : > { %s1809_s9 = smov 256   ;;  %s1810_s10 = smov 16  }
  0x2a   : > { %1572 = dma.hbm_to_vmem [thread:$0]  (!%p1935_p11), %s2825_s2, 1792, %s1928_s23, [#allocation8], %s1809_s9, %s1809_s9, %s1810_s10  }
  0x2b   : > { %p47_p2 = scmp.eq.s32.totalorder %s46_s27, 0  ;;  %p56_p1 = scmp.ne.s32.totalorder %s1802_s16, %s1798_s15 }
  0x2c   : > { %p57_p4 = scmp.eq.s32.totalorder %s1806_s17, 0  ;;  %p1582_p6 = scmp.lt.s32.totalorder %s1806_s17, 2 }
  0x2d   : > { %s1971_s13 = scalar_select %p47_p2, %s1802_s16, %s49_s26  }
  0x2e   : > { %p58_p8 = por %p57_p4, %p56_p1  ;;  %p2834_p10 = scmp.eq.s32.totalorder %s1905_s0, 1 }
  0x2f   : > { %s149_s22 = sand.u32 1, %s1802_s16   ;;  %s1559_s28 = sshll.u32 %s1806_s17, 7 }
  0x30   : > { %p1975_p12 = por %p2834_p10, %p56_p1  ;;  %s1545_s29 = sshll.u32 %s149_s22, 3 }
  0x31   : > { %s1984_s4 = scalar_lea.hbm %s2824_s1, %s1559_s28  ;;  %s153_s23 = scalar_lea.vmem [#allocation4], %s1545_s29 }
  0x32   : > { %s161_s26 = sshll.u32 %s153_s23, 4  ;;  %p1986_p11 = pnand %p1582_p6, %p58_p8  ;;  %s1990_s26 = int_to_ptr.vmem [resolvable:$true] %s161_s26 }
  0x33   : > { %s150_s5 = scalar_lea.sflag [#allocation5], %s149_s22  ;;  %s1706_s6 = scalar_lea.hbm %s1984_s4, 128 }
  0x34   : > { %p1707_p13 = scmp.ne.s32.totalorder %s1984_s4, %s1706_s6  ;;  %p1708_p0 = pneg %p1986_p11 }
  0x35   : > { %s1711_s9 = scalar_lea.hbm %s2824_s1, 256  ;;  %p1712_p7 = scmp.lt.u32.totalorder %s1984_s4, %s2824_s1 }
  0x36   : > { %p1709_p3 = pnand %p1708_p0, %p1707_p13  ;;  %p1713_p9 = scmp.lt.u32.totalorder %s1711_s9, %s1706_s6 }
  0x37   : > { %p1715_p1 = scmp.lt.u32.totalorder %s1706_s6, %s1984_s4 }
  0x38   : > { %p1710_p5 = pneg %p1709_p3  ;;  %p1714_p2 = por %p1713_p9, %p1712_p7 }
  0x3a   : > { %p1716_p4 = por %p1715_p1, %p1714_p2 }
  0x3c   : > { %p1717_p6 = pnand %p1716_p4, %p1710_p5 }
  0x3e   : > { %1720 = shalt.err (!%p1717_p6)
}
  0x3f   : > { %s1721_s12 = scalar_lea.vmem %s1990_s26, 128  ;;  %s1811_s22 = smov [#allocation4]  }
  0x40   : > { %p1722_p8 = scmp.ne.s32.totalorder %s1990_s26, %s1721_s12  ;;  %s1726_s28 = sshll.u32 %s1811_s22, 4  ;;  %s1727_s28 = int_to_ptr.vmem [resolvable:$false] %s1726_s28 }
  0x41   : > { %s1728_s29 = scalar_lea.vmem %s1727_s28, 256  ;;  %p1729_p3 = scmp.lt.s32.totalorder %s1990_s26, %s1727_s28 }
  0x42   : > { %p1724_p10 = pnand %p1722_p8, %p1708_p0  ;;  %p1730_p7 = scmp.lt.s32.totalorder %s1728_s29, %s1721_s12 }
  0x44   : > { %p1725_p13 = pneg %p1724_p10  ;;  %p1731_p9 = por %p1730_p7, %p1729_p3 }
  0x46   : > { %p1732_p2 = pnand %p1731_p9, %p1725_p13 }
  0x48   : > { %1735 = shalt.err (!%p1732_p2)
}
  0x49   : > { %1576 = dma.hbm_to_vmem [thread:$0]  (!%p1986_p11), %s1984_s4, 128, %s1990_s26, %s150_s5  }
  0x4a   : > { %p2837_p5 = scmp.ne.s32.totalorder %s2832_s21, 0 }
  0x4b   : > { %s2020_s24 = sand.u32 (!%p2837_p5), 1, %s1798_s15   ;;  %p2838_p0 = scmp.ne.s32.totalorder (!%p2837_p5), %s2830_s19, 0 }
  0x4c   : > { %170 = sbr.rel (%p2837_p5) target bundleno = 471 (0x1d7), region = 32  ;;  %s1549_s30 = sshll.u32 (!%p2837_p5), %s2020_s24, 3 }
  0x4d   : > { %s173_s23 = scalar_lea.sflag (!%p2837_p5), [#allocation5], %s2020_s24  ;;  %s2026_s6 = scalar_lea.vmem (!%p2837_p5), [#allocation4], %s1549_s30 }
  0x53   : > { %1781 = dma.done.wait (%p2838_p0), %s173_s23, 128  }
  0x54   : > { %1783 = vsyncadd (%p2838_p0), %s173_s23, 4294967168  ;;  %p2839_p11 = scmp.eq.s32.totalorder %s1905_s0, 0 }
  0x56   : > { %1785 = dma.done.wait (%p2839_p11), [#allocation8], 1792   ;;  %p2840_p1 = pmov %p2839_p11 }
  0x57   : > { %vm207_vm0 = vcmask 1043456   ;;  %v203_v0 = vld [vmem:[%s2026_s6] sm:$0xff]  ;;  %s1812_s19 = smov 50   ;;  %s1813_s21 = smov 51   ;;  %v246_v34 = vlaneseq }
  0x58   : > { %1787 = vsyncadd (%p2840_p1), [#allocation8], 4294965504  ;;  %v208_v1 = vsel %vm207_vm0, %v203_v0, 0.0  ;;  %v222_v2 = vsel %vm207_vm0, %v203_v0, -inf  ;;  %v205_v3 = vcombine.high %v203_v0, %v203_v0  ;;  %s1814_s4 = smov 49   ;;  %s1815_s26 = smov 48  }
  0x59   : > { %v209_v4 = vrot.slane %v208_v1, 4  ;;  %v223_v5 = vrot.slane %v222_v2, 4  ;;  %s1816_s27 = smov 47   ;;  %s1817_s5 = smov 46   ;;  %v2099_v35 = vand.u32 127, %v246_v34  ;;  %v254_v50 = vshrl.u32 %v246_v34, 7 }
  0x5a   : > { %v215_v6 = vsel %vm207_vm0, %v205_v3, 0.0  ;;  %v229_v7 = vsel %vm207_vm0, %v205_v3, -inf  ;;  %s1818_s7 = smov 45   ;;  %s1819_s8 = smov 35  }
  0x5b   : > { %v210_v8 = vadd.f32 %v209_v4, %v208_v1  ;;  %v224_v9 = vmax.f32 %v222_v2, %v223_v5  ;;  %v216_v10 = vrot.slane %v215_v6, 4  ;;  %v230_v11 = vrot.slane %v229_v7, 4  ;;  %s1820_s9 = smov 34   ;;  %s1821_s10 = smov 33  }
  0x5c   : > { %s1822_s11 = smov 32   ;;  %s1823_s12 = smov 31   ;;  %vm271_vm1 = vcmp.lt.s32.totalorder %v2099_v35, 50  ;;  %vm295_vm2 = vcmp.lt.s32.totalorder %v2099_v35, 49  ;;  %vm319_vm3 = vcmp.lt.s32.totalorder %v2099_v35, 48  ;;  %vm343_vm4 = vcmp.lt.s32.totalorder %v2099_v35, 47 }
  0x5d   : > { %v211_v12 = vrot.slane %v210_v8, 2  ;;  %v225_v13 = vrot.slane %v224_v9, 2  ;;  %v217_v14 = vadd.f32 %v216_v10, %v215_v6  ;;  %v231_v15 = vmax.f32 %v229_v7, %v230_v11  ;;  %s1824_s22 = smov 30   ;;  %s1825_s28 = smov 29  }
  0x5e   : > { %s1826_s29 = smov 19   ;;  %s1827_s23 = smov 18   ;;  %vm367_vm5 = vcmp.lt.s32.totalorder %v2099_v35, 46  ;;  %v251_v55 = vld [vmem:[#allocation7] ss:$8 sm:$0x3] }
  0x5f   : > { %v212_v16 = vadd.f32 %v211_v12, %v210_v8  ;;  %v226_v17 = vmax.f32 %v224_v9, %v225_v13  ;;  %v218_v18 = vrot.slane %v217_v14, 2  ;;  %v232_v19 = vrot.slane %v231_v15, 2  ;;  %v275_v60 = vld [vmem:[#allocation7 + $0x1] ss:$8 sm:$0x3] }
  0x60   : > { %v2136_v56 = vsub.s32 0, %v254_v50  ;;  %v2138_v57 = vsub.s32 1, %v254_v50  ;;  %v299_v61 = vld [vmem:[#allocation7 + $0x2] ss:$8 sm:$0x3]  ;;  %vm391_vm6 = vcmp.lt.s32.totalorder %v2099_v35, 45 }
  0x61   : > { %v213_v20 = vrot.slane %v212_v16, 1  ;;  %v227_v21 = vrot.slane %v226_v17, 1  ;;  %v219_v22 = vadd.f32 %v218_v18, %v217_v14  ;;  %v233_v23 = vmax.f32 %v231_v15, %v232_v19  ;;  %v323_v5 = vld [vmem:[#allocation7 + $0x3] ss:$8 sm:$0x3] }
  0x62   : > { %vm248_vm7 = vcmp.lt.s32.totalorder %v2099_v35, 51  ;;  %v256_v0 = vrot.slane %v251_v55, %v2136_v56  ;;  %v260_v1 = vrot.slane %v251_v55, %v2138_v57  ;;  %v280_v2 = vrot.slane %v275_v60, %v2136_v56  ;;  %v347_v6 = vld [vmem:[#allocation7 + $0x4] ss:$8 sm:$0x3] }
  0x63   : > { %v214_v24 = vadd.f32 %v213_v20, %v212_v16  ;;  %v228_v25 = vmax.f32 %v226_v17, %v227_v21  ;;  %v220_v26 = vrot.slane %v219_v22, 1  ;;  %v234_v27 = vrot.slane %v233_v23, 1 }
  0x64   : > { %v284_v3 = vrot.slane %v275_v60, %v2138_v57  ;;  %v304_v4 = vrot.slane %v299_v61, %v2136_v56  ;;  %v308_v14 = vrot.slane %v299_v61, %v2138_v57  ;;  %vm415_vm8 = vcmp.lt.s32.totalorder %v2099_v35, 35 }
  0x65   : > { %v236_v28 = vmul.f32 0.25, %v214_v24  ;;  %v221_v29 = vadd.f32 %v220_v26, %v219_v22  ;;  %v235_v30 = vmax.f32 %v233_v23, %v234_v27  ;;  %v328_v17 = vrot.slane %v323_v5, %v2136_v56  ;;  %v371_v22 = vld [vmem:[#allocation7 + $0x5] ss:$8 sm:$0x3] }
  0x66   : > { %v332_v18 = vrot.slane %v323_v5, %v2138_v57  ;;  %v352_v19 = vrot.slane %v347_v6, %v2136_v56  ;;  %v395_v23 = vld [vmem:[#allocation7 + $0x6] ss:$8 sm:$0x3]  ;;  %vm439_vm9 = vcmp.lt.s32.totalorder %v2099_v35, 34  ;;  %vm463_vm10 = vcmp.lt.s32.totalorder %v2099_v35, 33 }
  0x67   : > { %v2037_v31 = vadd.f32 %v236_v28, %v228_v25  ;;  %v237_v32 = vmul.f32 0.25, %v221_v29  ;;  %v356_v28 = vrot.slane %v347_v6, %v2138_v57  ;;  %v491_v6 = vld [vmem:[#allocation7 + $0x12] ss:$8 sm:$0x3]  ;;  %vm487_vm11 = vcmp.lt.s32.totalorder %v2099_v35, 32 }
  0x68   : > { %vm511_vm12 = vcmp.lt.s32.totalorder %v2099_v35, 31  ;;  %vm535_vm13 = vcmp.lt.s32.totalorder %v2099_v35, 30  ;;  %vm559_vm14 = vcmp.lt.s32.totalorder %v2099_v35, 29  ;;  %vm583_vm15 = vcmp.lt.s32.totalorder %v2099_v35, 19 }
  0x69   : > { %267 = vrot.lane.b32.xlu1 %v2037_v31, %s1812_s19  ;;  %242 = vrot.lane.b32.xlu0 %v2037_v31, %s1813_s21  ;;  %v2041_v33 = vadd.f32 %v237_v32, %v235_v30  ;;  %vm607_vm0 = vcmp.lt.s32.totalorder %v2099_v35, 18 }
  0x6d   : > { %291 = vrot.lane.b32.xlu0 %v2037_v31, %s1814_s4  ;;  %269 = vrot.lane.b32.xlu1 %v2041_v33, %s1812_s19  ;;  %s1828_s19 = smov 17  }
  0x71   : > { %315 = vrot.lane.b32.xlu0 %v2037_v31, %s1815_s26  ;;  %293 = vrot.lane.b32.xlu1 %v2041_v33, %s1814_s4  ;;  %s1830_s4 = smov 15  }
  0x75   : > { %339 = vrot.lane.b32.xlu0 %v2037_v31, %s1816_s27  ;;  %317 = vrot.lane.b32.xlu1 %v2041_v33, %s1815_s26  ;;  %s1831_s26 = smov 14  }
  0x79   : > { %363 = vrot.lane.b32.xlu0 %v2037_v31, %s1817_s5  ;;  %341 = vrot.lane.b32.xlu1 %v2041_v33, %s1816_s27  ;;  %s1832_s27 = smov 13  }
  0x7d   : > { %387 = vrot.lane.b32.xlu0 %v2037_v31, %s1818_s7  ;;  %365 = vrot.lane.b32.xlu1 %v2041_v33, %s1817_s5  ;;  %s1833_s5 = smov 3  }
  0x81   : > { %389 = vrot.lane.b32.xlu1 %v2041_v33, %s1818_s7  ;;  %244 = vrot.lane.b32.xlu0 %v2041_v33, %s1813_s21  ;;  %s1829_s21 = smov 16   ;;  %s1834_s7 = smov 2  }
  0x85   : > { %413 = vrot.lane.b32.xlu1 %v2041_v33, %s1819_s8  ;;  %411 = vrot.lane.b32.xlu0 %v2037_v31, %s1819_s8  ;;  %s1835_s8 = smov 1  }
  0x89   : > { %437 = vrot.lane.b32.xlu1 %v2041_v33, %s1820_s9  ;;  %435 = vrot.lane.b32.xlu0 %v2037_v31, %s1820_s9  ;;  %s1836_s9 = smov 127  }
  0x8d   : > { %461 = vrot.lane.b32.xlu1 %v2041_v33, %s1821_s10  ;;  %459 = vrot.lane.b32.xlu0 %v2037_v31, %s1821_s10  ;;  %s1837_s10 = smov 126  }
  0x91   : > { %485 = vrot.lane.b32.xlu1 %v2041_v33, %s1822_s11  ;;  %483 = vrot.lane.b32.xlu0 %v2037_v31, %s1822_s11  ;;  %s1838_s11 = smov 125  }
  0x95   : > { %509 = vrot.lane.b32.xlu1 %v2041_v33, %s1823_s12  ;;  %507 = vrot.lane.b32.xlu0 %v2037_v31, %s1823_s12  ;;  %s1839_s12 = smov 115  }
  0x99   : > { %533 = vrot.lane.b32.xlu1 %v2041_v33, %s1824_s22  ;;  %531 = vrot.lane.b32.xlu0 %v2037_v31, %s1824_s22  ;;  %s1840_s22 = smov 114  }
  0x9d   : > { %557 = vrot.lane.b32.xlu1 %v2041_v33, %s1825_s28  ;;  %555 = vrot.lane.b32.xlu0 %v2037_v31, %s1825_s28  ;;  %s1841_s28 = smov 113  }
  0xa1   : > { %581 = vrot.lane.b32.xlu1 %v2041_v33, %s1826_s29  ;;  %579 = vrot.lane.b32.xlu0 %v2037_v31, %s1826_s29  ;;  %s1842_s29 = smov 112  }
  0xa5   : > { %605 = vrot.lane.b32.xlu1 %v2041_v33, %s1827_s23  ;;  %603 = vrot.lane.b32.xlu0 %v2037_v31, %s1827_s23  ;;  %s1843_s23 = smov 111  }
  0xa9   : > { %629 = vrot.lane.b32.xlu1 %v2041_v33, %s1828_s19  ;;  %627 = vrot.lane.b32.xlu0 %v2037_v31, %s1828_s19  ;;  %s1844_s19 = smov 110  }
  0xad   : > { %653 = vrot.lane.b32.xlu1 %v2041_v33, %s1829_s21  ;;  %651 = vrot.lane.b32.xlu0 %v2037_v31, %s1829_s21  ;;  %s2127_s21 = sld [smem:[#allocation3]] }
  0xb1   : > { %677 = vrot.lane.b32.xlu1 %v2041_v33, %s1830_s4  ;;  %675 = vrot.lane.b32.xlu0 %v2037_v31, %s1830_s4  ;;  %s1845_s4 = smov 109  }
  0xb3   : > { %v241_v8 = vstv %s2127_s21  ;;  %s1560_s21 = sshll.u32 %s1905_s0, 7  ;;  %s1860_s0 = smov [#allocation9]  }
  0xb5   : > { %701 = vrot.lane.b32.xlu1 %v2041_v33, %s1831_s26  ;;  %699 = vrot.lane.b32.xlu0 %v2037_v31, %s1831_s26  ;;  %s1846_s26 = smov 99  }
  0xb9   : > { %725 = vrot.lane.b32.xlu1 %v2041_v33, %s1832_s27  ;;  %723 = vrot.lane.b32.xlu0 %v2037_v31, %s1832_s27  ;;  %s1847_s27 = smov 98  }
  0xbd   : > { %749 = vrot.lane.b32.xlu1 %v2041_v33, %s1833_s5  ;;  %747 = vrot.lane.b32.xlu0 %v2037_v31, %s1833_s5  ;;  %s1848_s5 = smov 97  }
  0xc1   : > { %773 = vrot.lane.b32.xlu1 %v2041_v33, %s1834_s7  ;;  %771 = vrot.lane.b32.xlu0 %v2037_v31, %s1834_s7  ;;  %s1849_s7 = smov 96  }
  0xc5   : > { %797 = vrot.lane.b32.xlu1 %v2041_v33, %s1835_s8  ;;  %795 = vrot.lane.b32.xlu0 %v2037_v31, %s1835_s8  ;;  %s1850_s8 = smov 95  }
  0xc9   : > { %838 = vrot.lane.b32.xlu1 %v2041_v33, %s1836_s9  ;;  %836 = vrot.lane.b32.xlu0 %v2037_v31, %s1836_s9  ;;  %s1851_s9 = smov 94  }
  0xcd   : > { %862 = vrot.lane.b32.xlu1 %v2041_v33, %s1837_s10  ;;  %860 = vrot.lane.b32.xlu0 %v2037_v31, %s1837_s10  ;;  %s1852_s10 = smov 93  }
  0xd1   : > { %886 = vrot.lane.b32.xlu1 %v2041_v33, %s1838_s11  ;;  %884 = vrot.lane.b32.xlu0 %v2037_v31, %s1838_s11  ;;  %s1853_s11 = smov 83  }
  0xd5   : > { %910 = vrot.lane.b32.xlu1 %v2041_v33, %s1839_s12  ;;  %908 = vrot.lane.b32.xlu0 %v2037_v31, %s1839_s12  ;;  %s1854_s12 = smov 82  }
  0xd9   : > { %934 = vrot.lane.b32.xlu1 %v2041_v33, %s1840_s22  ;;  %932 = vrot.lane.b32.xlu0 %v2037_v31, %s1840_s22  ;;  %s1855_s22 = smov 81  }
  0xdb   : > { %v268_v36 = vpop.permute.xlu1 %267  ;;  %v2101_v37 = vpop.permute.xlu0 %242 }
  0xdd   : > { %958 = vrot.lane.b32.xlu1 %v2041_v33, %s1841_s28  ;;  %956 = vrot.lane.b32.xlu0 %v2037_v31, %s1841_s28  ;;  %s1856_s28 = smov 80  }
  0xdf   : > { %v292_v38 = vpop.permute.xlu0 %291  ;;  %v270_v39 = vpop.permute.xlu1 %269 }
  0xe0   : > { %v2106_v40 = vsel %vm271_vm1, %v268_v36, %v270_v39  ;;  %v2108_v41 = vsel %vm271_vm1, %v270_v39, %v268_v36  ;;  %v380_v39 = vrot.slane %v371_v22, %v2138_v57  ;;  %vm631_vm1 = vcmp.lt.s32.totalorder %v2099_v35, 17 }
  0xe1   : > { %982 = vrot.lane.b32.xlu1 %v2041_v33, %s1842_s29  ;;  %980 = vrot.lane.b32.xlu0 %v2037_v31, %s1842_s29  ;;  %v287_v20 = vmul.f32 %v280_v2, %v2108_v41  ;;  %v288_v21 = vmul.f32 %v284_v3, %v2106_v40  ;;  %v400_v40 = vrot.slane %v395_v23, %v2136_v56  ;;  %s1857_s29 = smov 79  }
  0xe3   : > { %v316_v42 = vpop.permute.xlu0 %315  ;;  %v294_v43 = vpop.permute.xlu1 %293 }
  0xe4   : > { %v2113_v44 = vsel %vm295_vm2, %v292_v38, %v294_v43  ;;  %v2115_v45 = vsel %vm295_vm2, %v294_v43, %v292_v38  ;;  %v376_v38 = vrot.slane %v371_v22, %v2136_v56  ;;  %v500_v22 = vrot.slane %v491_v6, %v2138_v57 }
  0xe5   : > { %1006 = vrot.lane.b32.xlu1 %v2041_v33, %s1843_s23  ;;  %1004 = vrot.lane.b32.xlu0 %v2037_v31, %s1843_s23  ;;  %v311_v32 = vmul.f32 %v304_v4, %v2115_v45  ;;  %v312_v34 = vmul.f32 %v308_v14, %v2113_v44  ;;  %v419_v44 = vld [vmem:[#allocation7 + $0x7] ss:$8 sm:$0x3]  ;;  %v467_v4 = vld [vmem:[#allocation7 + $0x11] ss:$8 sm:$0x3] }
  0xe6   : > { %v424_v60 = vrot.slane %v419_v44, %v2136_v56  ;;  %v428_v61 = vrot.slane %v419_v44, %v2138_v57  ;;  %v472_v14 = vrot.slane %v467_v4, %v2136_v56  ;;  %s1858_s23 = smov 78   ;;  %vm655_vm2 = vcmp.lt.s32.totalorder %v2099_v35, 16 }
  0xe7   : > { %v340_v46 = vpop.permute.xlu0 %339  ;;  %v318_v47 = vpop.permute.xlu1 %317 }
  0xe8   : > { %v2120_v48 = vsel %vm319_vm3, %v316_v42, %v318_v47  ;;  %v2122_v49 = vsel %vm319_vm3, %v318_v47, %v316_v42  ;;  %v443_v47 = vld [vmem:[#allocation7 + $0x10] ss:$8 sm:$0x3]  ;;  %vm679_vm3 = vcmp.lt.s32.totalorder %v2099_v35, 15 }
  0xe9   : > { %1030 = vrot.lane.b32.xlu1 %v2041_v33, %s1844_s19  ;;  %1028 = vrot.lane.b32.xlu0 %v2037_v31, %s1844_s19  ;;  %v335_v41 = vmul.f32 %v328_v17, %v2122_v49  ;;  %v336_v42 = vmul.f32 %v332_v18, %v2120_v48  ;;  %s1859_s19 = smov 77  }
  0xeb   : > { %v364_v51 = vpop.permute.xlu0 %363  ;;  %v342_v52 = vpop.permute.xlu1 %341 }
  0xec   : > { %v2129_v53 = vsel %vm343_vm4, %v340_v46, %v342_v52  ;;  %v2131_v54 = vsel %vm343_vm4, %v342_v52, %v340_v46  ;;  %vm703_vm4 = vcmp.lt.s32.totalorder %v2099_v35, 14 }
  0xed   : > { %1054 = vrot.lane.b32.xlu1 %v2041_v33, %s1845_s4  ;;  %1052 = vrot.lane.b32.xlu0 %v2037_v31, %s1845_s4  ;;  %v359_v49 = vmul.f32 %v352_v19, %v2131_v54  ;;  %v360_v48 = vmul.f32 %v356_v28, %v2129_v53  ;;  %s202_s4 = scalar_lea.vmem [#allocation9], %s1549_s30  ;;  %s1740_s30 = sshll.u32 %s1860_s0, 4  ;;  %s1741_s30 = int_to_ptr.vmem [resolvable:$false] %s1740_s30 }
  0xef   : > { %v388_v58 = vpop.permute.xlu0 %387  ;;  %v366_v59 = vpop.permute.xlu1 %365 }
  0xf0   : > { %v2140_v62 = vsel %vm367_vm5, %v364_v51, %v366_v59  ;;  %v2142_v63 = vsel %vm367_vm5, %v366_v59, %v364_v51  ;;  %v404_v51 = vrot.slane %v395_v23, %v2138_v57  ;;  %vm727_vm5 = vcmp.lt.s32.totalorder %v2099_v35, 13 }
  0xf1   : > { %1078 = vrot.lane.b32.xlu1 %v2041_v33, %s1846_s26  ;;  %1076 = vrot.lane.b32.xlu0 %v2037_v31, %s1846_s26  ;;  %v384_v2 = vmul.f32 %v380_v39, %v2140_v62  ;;  %s1461_s26 = sshll.u32 %s202_s4, 4  ;;  %s2781_s26 = int_to_ptr.vmem [resolvable:$true] %s1461_s26 }
  0xf2   : > { %p1743_p10 = scmp.lt.s32.totalorder %s2781_s26, %s1741_s30 }
  0xf3   : > { %v390_v7 = vpop.permute.xlu1 %389  ;;  %v245_v9 = vpop.permute.xlu0 %244 }
  0xf4   : > { %v2154_v10 = vsel %vm391_vm6, %v388_v58, %v390_v7  ;;  %v2156_v11 = vsel %vm391_vm6, %v390_v7, %v388_v58  ;;  %v249_v12 = vsel %vm248_vm7, %v2101_v37, %v245_v9  ;;  %v250_v13 = vsel %vm248_vm7, %v245_v9, %v2101_v37 }
  0xf5   : > { %v263_v15 = vmul.f32 %v256_v0, %v250_v13  ;;  %v264_v16 = vmul.f32 %v260_v1, %v249_v12  ;;  %1102 = vrot.lane.b32.xlu1 %v2041_v33, %s1847_s27  ;;  %1100 = vrot.lane.b32.xlu0 %v2037_v31, %s1847_s27  ;;  %v448_v0 = vrot.slane %v443_v47, %v2136_v56  ;;  %vm751_vm6 = vcmp.lt.s32.totalorder %v2099_v35, 3 }
  0xf6   : > { %v383_v1 = vmul.f32 %v376_v38, %v2142_v63  ;;  %v452_v7 = vrot.slane %v443_v47, %v2138_v57  ;;  %v407_v63 = vmul.f32 %v400_v40, %v2156_v11  ;;  %v408_v62 = vmul.f32 %v404_v51, %v2154_v10  ;;  %v515_v10 = vld [vmem:[#allocation7 + $0x13] ss:$8 sm:$0x3]  ;;  %v563_v51 = vld [vmem:[#allocation7 + $0x15] ss:$8 sm:$0x3] }
  0xf7   : > { %v265_v24 = vadd.f32 %v263_v15, %v241_v8  ;;  %v266_v25 = vadd.f32 %v264_v16, %v241_v8  ;;  %v414_v26 = vpop.permute.xlu1 %413  ;;  %v412_v27 = vpop.permute.xlu0 %411  ;;  %v476_v15 = vrot.slane %v467_v4, %v2138_v57  ;;  %v496_v16 = vrot.slane %v491_v6, %v2136_v56  ;;  %v587_v4 = vld [vmem:[#allocation7 + $0x16] ss:$8 sm:$0x3] }
  0xf8   : > { %v416_v29 = vsel %vm415_vm8, %v412_v27, %v414_v26  ;;  %v417_v30 = vsel %vm415_vm8, %v414_v26, %v412_v27  ;;  %vm775_vm7 = vcmp.lt.s32.totalorder %v2099_v35, 2  ;;  %vm799_vm8 = vcmp.lt.s32.totalorder %v2099_v35, 1 }
  0xf9   : > { %v289_v36 = vadd.f32 %v287_v20, %v265_v24  ;;  %v290_v37 = vadd.f32 %v288_v21, %v266_v25  ;;  %1126 = vrot.lane.b32.xlu1 %v2041_v33, %s1848_s5  ;;  %1124 = vrot.lane.b32.xlu0 %v2037_v31, %s1848_s5  ;;  %v431_v19 = vmul.f32 %v424_v60, %v417_v30 }
  0xfa   : > { %v432_v20 = vmul.f32 %v428_v61, %v416_v29  ;;  %v539_v29 = vld [vmem:[#allocation7 + $0x14] ss:$8 sm:$0x3]  ;;  %v520_v30 = vrot.slane %v515_v10, %v2136_v56 }
  0xfb   : > { %v313_v43 = vadd.f32 %v311_v32, %v289_v36  ;;  %v314_v45 = vadd.f32 %v312_v34, %v290_v37  ;;  %v438_v46 = vpop.permute.xlu1 %437  ;;  %v436_v50 = vpop.permute.xlu0 %435  ;;  %v524_v32 = vrot.slane %v515_v10, %v2138_v57 }
  0xfc   : > { %v440_v52 = vsel %vm439_vm9, %v436_v50, %v438_v46  ;;  %v441_v55 = vsel %vm439_vm9, %v438_v46, %v436_v50  ;;  %vm840_vm9 = vcmp.lt.s32.totalorder %v2099_v35, 127 }
  0xfd   : > { %v337_v58 = vadd.f32 %v335_v41, %v313_v43  ;;  %v338_v59 = vadd.f32 %v336_v42, %v314_v45  ;;  %1150 = vrot.lane.b32.xlu1 %v2041_v33, %s1849_s7  ;;  %1148 = vrot.lane.b32.xlu0 %v2037_v31, %s1849_s7  ;;  %v455_v27 = vmul.f32 %v448_v0, %v441_v55  ;;  %s2779_s7 = scalar_lea.hbm %s2826_s3, %s1560_s21 }
  0xfe   : > { %v456_v28 = vmul.f32 %v452_v7, %v440_v52  ;;  %v544_v43 = vrot.slane %v539_v29, %v2136_v56  ;;  %v548_v45 = vrot.slane %v539_v29, %v2138_v57  ;;  %v568_v0 = vrot.slane %v563_v51, %v2136_v56 }
  0xff   : > { %v361_v54 = vadd.f32 %v359_v49, %v337_v58  ;;  %v362_v3 = vadd.f32 %v360_v48, %v338_v59  ;;  %v462_v53 = vpop.permute.xlu1 %461  ;;  %v460_v5 = vpop.permute.xlu0 %459 }
 0x100   : > { %v464_v8 = vsel %vm463_vm10, %v460_v5, %v462_v53  ;;  %v465_v9 = vsel %vm463_vm10, %v462_v53, %v460_v5  ;;  %vm864_vm10 = vcmp.lt.s32.totalorder %v2099_v35, 126 }
 0x101   : > { %v385_v12 = vadd.f32 %v383_v1, %v361_v54  ;;  %v386_v13 = vadd.f32 %v384_v2, %v362_v3  ;;  %1174 = vrot.lane.b32.xlu1 %v2041_v33, %s1850_s8  ;;  %1172 = vrot.lane.b32.xlu0 %v2037_v31, %s1850_s8  ;;  %v479_v37 = vmul.f32 %v472_v14, %v465_v9  ;;  %s1447_s8 = scalar_lea.sflag [#allocation6], %s2020_s24 }
 0x102   : > { %v480_v38 = vmul.f32 %v476_v15, %v464_v8  ;;  %v572_v1 = vrot.slane %v563_v51, %v2138_v57  ;;  %v596_v14 = vrot.slane %v587_v4, %v2138_v57 }
 0x103   : > { %v409_v17 = vadd.f32 %v407_v63, %v385_v12  ;;  %v410_v18 = vadd.f32 %v408_v62, %v386_v13  ;;  %v486_v11 = vpop.permute.xlu1 %485  ;;  %v484_v21 = vpop.permute.xlu0 %483  ;;  %v592_v13 = vrot.slane %v587_v4, %v2136_v56  ;;  %v707_v4 = vld [vmem:[#allocation7 + $0x23] ss:$8 sm:$0x3] }
 0x104   : > { %v488_v23 = vsel %vm487_vm11, %v484_v21, %v486_v11  ;;  %v489_v24 = vsel %vm487_vm11, %v486_v11, %v484_v21  ;;  %vm888_vm11 = vcmp.lt.s32.totalorder %v2099_v35, 125 }
 0x105   : > { %v433_v25 = vadd.f32 %v431_v19, %v409_v17  ;;  %v434_v26 = vadd.f32 %v432_v20, %v410_v18  ;;  %1198 = vrot.lane.b32.xlu1 %v2041_v33, %s1851_s9  ;;  %1196 = vrot.lane.b32.xlu0 %v2037_v31, %s1851_s9  ;;  %v503_v47 = vmul.f32 %v496_v16, %v489_v24  ;;  %s1736_s9 = scalar_lea.vmem %s2781_s26, 128 }
 0x106   : > { %v504_v50 = vmul.f32 %v500_v22, %v488_v23  ;;  %p1737_p4 = scmp.ne.s32.totalorder %s2781_s26, %s1736_s9 }
 0x107   : > { %v457_v34 = vadd.f32 %v455_v27, %v433_v25  ;;  %v458_v36 = vadd.f32 %v456_v28, %v434_v26  ;;  %v510_v39 = vpop.permute.xlu1 %509  ;;  %v508_v40 = vpop.permute.xlu0 %507 }
 0x108   : > { %v512_v41 = vsel %vm511_vm12, %v508_v40, %v510_v39  ;;  %v513_v42 = vsel %vm511_vm12, %v510_v39, %v508_v40  ;;  %vm912_vm12 = vcmp.lt.s32.totalorder %v2099_v35, 115  ;;  %p1738_p6 = pnand %p1737_p4, %p1975_p12 }
 0x109   : > { %v481_v44 = vadd.f32 %v479_v37, %v457_v34  ;;  %v482_v46 = vadd.f32 %v480_v38, %v458_v36  ;;  %1222 = vrot.lane.b32.xlu1 %v2041_v33, %s1852_s10  ;;  %1220 = vrot.lane.b32.xlu0 %v2037_v31, %s1852_s10  ;;  %v527_v49 = vmul.f32 %v520_v30, %v513_v42 }
 0x10a   : > { %v528_v48 = vmul.f32 %v524_v32, %v512_v41  ;;  %p1739_p8 = pneg %p1738_p6 }
 0x10b   : > { %v505_v52 = vadd.f32 %v503_v47, %v481_v44  ;;  %v506_v55 = vadd.f32 %v504_v50, %v482_v46  ;;  %v534_v58 = vpop.permute.xlu1 %533  ;;  %v532_v59 = vpop.permute.xlu0 %531 }
 0x10c   : > { %v536_v60 = vsel %vm535_vm13, %v532_v59, %v534_v58  ;;  %v537_v61 = vsel %vm535_vm13, %v534_v58, %v532_v59  ;;  %v635_v59 = vld [vmem:[#allocation7 + $0x20] ss:$8 sm:$0x3]  ;;  %vm936_vm13 = vcmp.lt.s32.totalorder %v2099_v35, 114 }
 0x10d   : > { %v529_v2 = vadd.f32 %v527_v49, %v505_v52  ;;  %v530_v54 = vadd.f32 %v528_v48, %v506_v55  ;;  %v551_v3 = vmul.f32 %v544_v43, %v537_v61  ;;  %v552_v53 = vmul.f32 %v548_v45, %v536_v60  ;;  %1246 = vrot.lane.b32.xlu1 %v2041_v33, %s1853_s11  ;;  %v611_v49 = vld [vmem:[#allocation7 + $0x17] ss:$8 sm:$0x3]  ;;  %v659_v60 = vld [vmem:[#allocation7 + $0x21] ss:$8 sm:$0x3] }
 0x10e   : > { %1244 = vrot.lane.b32.xlu0 %v2037_v31, %s1853_s11  ;;  %v616_v61 = vrot.slane %v611_v49, %v2136_v56 }
 0x10f   : > { %v553_v5 = vadd.f32 %v551_v3, %v529_v2  ;;  %v554_v6 = vadd.f32 %v552_v53, %v530_v54  ;;  %v558_v7 = vpop.permute.xlu1 %557  ;;  %v556_v8 = vpop.permute.xlu0 %555  ;;  %v640_v3 = vrot.slane %v635_v59, %v2136_v56  ;;  %v644_v53 = vrot.slane %v635_v59, %v2138_v57 }
 0x110   : > { %v560_v9 = vsel %vm559_vm14, %v556_v8, %v558_v7  ;;  %v561_v63 = vsel %vm559_vm14, %v558_v7, %v556_v8  ;;  %v664_v7 = vrot.slane %v659_v60, %v2136_v56  ;;  %v668_v8 = vrot.slane %v659_v60, %v2138_v57 }
 0x111   : > { %v575_v62 = vmul.f32 %v568_v0, %v561_v63  ;;  %v576_v12 = vmul.f32 %v572_v1, %v560_v9  ;;  %1270 = vrot.lane.b32.xlu1 %v2041_v33, %s1854_s12  ;;  %v620_v0 = vrot.slane %v611_v49, %v2138_v57  ;;  %v683_v1 = vld [vmem:[#allocation7 + $0x22] ss:$8 sm:$0x3]  ;;  %vm960_vm14 = vcmp.lt.s32.totalorder %v2099_v35, 113 }
 0x112   : > { %1268 = vrot.lane.b32.xlu0 %v2037_v31, %s1854_s12 }
 0x113   : > { %v577_v15 = vadd.f32 %v575_v62, %v553_v5  ;;  %v578_v16 = vadd.f32 %v576_v12, %v554_v6  ;;  %v582_v17 = vpop.permute.xlu1 %581  ;;  %v580_v18 = vpop.permute.xlu0 %579  ;;  %v688_v62 = vrot.slane %v683_v1, %v2136_v56  ;;  %v692_v12 = vrot.slane %v683_v1, %v2138_v57  ;;  %v779_v1 = vld [vmem:[#allocation7 + $0x26] ss:$8 sm:$0x3] }
 0x114   : > { %v584_v19 = vsel %vm583_vm15, %v580_v18, %v582_v17  ;;  %v585_v20 = vsel %vm583_vm15, %v582_v17, %v580_v18  ;;  %v755_v17 = vld [vmem:[#allocation7 + $0x25] ss:$8 sm:$0x3]  ;;  %vm984_vm15 = vcmp.lt.s32.totalorder %v2099_v35, 112 }
 0x115   : > { %v599_v11 = vmul.f32 %v592_v13, %v585_v20  ;;  %v600_v21 = vmul.f32 %v596_v14, %v584_v19  ;;  %1294 = vrot.lane.b32.xlu1 %v2041_v33, %s1855_s22  ;;  %v731_v13 = vld [vmem:[#allocation7 + $0x24] ss:$8 sm:$0x3]  ;;  %v716_v20 = vrot.slane %v707_v4, %v2138_v57 }
 0x116   : > { %1292 = vrot.lane.b32.xlu0 %v2037_v31, %s1855_s22 }
 0x117   : > { %v2247_v10 = vadd.f32 %v599_v11, %v577_v15  ;;  %v2249_v22 = vadd.f32 %v600_v21, %v578_v16  ;;  %v606_v23 = vpop.permute.xlu1 %605  ;;  %v604_v24 = vpop.permute.xlu0 %603  ;;  %v712_v16 = vrot.slane %v707_v4, %v2136_v56 }
 0x118   : > { %v608_v2 = vsel %vm607_vm0, %v604_v24, %v606_v23  ;;  %v609_v54 = vsel %vm607_vm0, %v606_v23, %v604_v24  ;;  %vm1008_vm0 = vcmp.lt.s32.totalorder %v2099_v35, 111 }
 0x119   : > { %1318 = vrot.lane.b32.xlu1 %v2041_v33, %s1856_s28  ;;  %v623_v14 = vmul.f32 %v616_v61, %v609_v54  ;;  %v624_v15 = vmul.f32 %v620_v0, %v608_v2 }
 0x11a   : > { %1316 = vrot.lane.b32.xlu0 %v2037_v31, %s1856_s28 }
 0x11b   : > { %v630_v25 = vpop.permute.xlu1 %629  ;;  %v628_v26 = vpop.permute.xlu0 %627  ;;  %v625_v59 = vadd.f32 %v623_v14, %v2247_v10  ;;  %v626_v60 = vadd.f32 %v624_v15, %v2249_v22 }
 0x11c   : > { %v632_v9 = vsel %vm631_vm1, %v628_v26, %v630_v25  ;;  %v633_v63 = vsel %vm631_vm1, %v630_v25, %v628_v26  ;;  %v736_v25 = vrot.slane %v731_v13, %v2136_v56  ;;  %v740_v26 = vrot.slane %v731_v13, %v2138_v57 }
 0x11d   : > { %1342 = vrot.lane.b32.xlu1 %v2041_v33, %s1857_s29  ;;  %v647_v23 = vmul.f32 %v640_v3, %v633_v63  ;;  %v648_v24 = vmul.f32 %v644_v53, %v632_v9  ;;  %v788_v9 = vrot.slane %v779_v1, %v2138_v57  ;;  %vm1032_vm1 = vcmp.lt.s32.totalorder %v2099_v35, 110 }
 0x11e   : > { %1340 = vrot.lane.b32.xlu0 %v2037_v31, %s1857_s29 }
 0x11f   : > { %v654_v27 = vpop.permute.xlu1 %653  ;;  %v652_v28 = vpop.permute.xlu0 %651  ;;  %v649_v54 = vadd.f32 %v647_v23, %v625_v59  ;;  %v650_v3 = vadd.f32 %v648_v24, %v626_v60 }
 0x120   : > { %v656_v18 = vsel %vm655_vm2, %v652_v28, %v654_v27  ;;  %v657_v19 = vsel %vm655_vm2, %v654_v27, %v652_v28  ;;  %v760_v28 = vrot.slane %v755_v17, %v2136_v56  ;;  %vm1056_vm2 = vcmp.lt.s32.totalorder %v2099_v35, 109 }
 0x121   : > { %1366 = vrot.lane.b32.xlu1 %v2041_v33, %s1858_s23  ;;  %v671_v61 = vmul.f32 %v664_v7, %v657_v19  ;;  %v672_v0 = vmul.f32 %v668_v8, %v656_v18  ;;  %v803_v7 = vld [vmem:[#allocation7 + $0x27] ss:$8 sm:$0x3] }
 0x122   : > { %1364 = vrot.lane.b32.xlu0 %v2037_v31, %s1858_s23 }
 0x123   : > { %v2257_v29 = vpop.permute.xlu1 %677  ;;  %v2259_v30 = vpop.permute.xlu0 %675  ;;  %v673_v63 = vadd.f32 %v671_v61, %v649_v54  ;;  %v674_v13 = vadd.f32 %v672_v0, %v650_v3  ;;  %v868_v54 = vld [vmem:[#allocation7 + $0x32] ss:$8 sm:$0x3] }
 0x124   : > { %v680_v49 = vsel %vm679_vm3, %v2259_v30, %v2257_v29  ;;  %v681_v27 = vsel %vm679_vm3, %v2257_v29, %v2259_v30  ;;  %v764_v30 = vrot.slane %v755_v17, %v2138_v57  ;;  %vm1080_vm3 = vcmp.lt.s32.totalorder %v2099_v35, 99 }
 0x125   : > { %1390 = vrot.lane.b32.xlu1 %v2041_v33, %s1859_s19  ;;  %v695_v53 = vmul.f32 %v688_v62, %v681_v27  ;;  %v696_v4 = vmul.f32 %v692_v12, %v680_v49  ;;  %v820_v12 = vld [vmem:[#allocation7 + $0x30] ss:$8 sm:$0x3] }
 0x126   : > { %1388 = vrot.lane.b32.xlu0 %v2037_v31, %s1859_s19  ;;  %v825_v49 = vrot.slane %v820_v12, %v2136_v56 }
 0x127   : > { %v2263_v32 = vpop.permute.xlu1 %701  ;;  %v2265_v34 = vpop.permute.xlu0 %699  ;;  %v698_v19 = vadd.f32 %v696_v4, %v674_v13 }
 0x128   : > { %v704_v2 = vsel %vm703_vm4, %v2265_v34, %v2263_v32  ;;  %v705_v29 = vsel %vm703_vm4, %v2263_v32, %v2265_v34  ;;  %v784_v34 = vrot.slane %v779_v1, %v2136_v56  ;;  %v832_v3 = vmul.f32 %v825_v49, %v2037_v31 }
 0x129   : > { %v719_v14 = vmul.f32 %v712_v16, %v705_v29  ;;  %v720_v62 = vmul.f32 %v716_v20, %v704_v2  ;;  %v697_v16 = vadd.f32 %v695_v53, %v673_v63  ;;  %vm1104_vm4 = vcmp.lt.s32.totalorder %v2099_v35, 98 }
 0x12b   : > { %v2267_v36 = vpop.permute.xlu1 %725  ;;  %v2269_v37 = vpop.permute.xlu0 %723  ;;  %v721_v27 = vadd.f32 %v719_v14, %v697_v16  ;;  %v722_v59 = vadd.f32 %v720_v62, %v698_v19  ;;  %v2424_v16 = vld [vmem:[#allocation7 + $0x36] ss:$8 sm:$0x3] }
 0x12c   : > { %v728_v8 = vsel %vm727_vm5, %v2269_v37, %v2267_v36  ;;  %v729_v32 = vsel %vm727_vm5, %v2267_v36, %v2269_v37  ;;  %v808_v36 = vrot.slane %v803_v7, %v2136_v56  ;;  %vm1128_vm5 = vcmp.lt.s32.totalorder %v2099_v35, 97 }
 0x12d   : > { %v743_v20 = vmul.f32 %v736_v25, %v729_v32  ;;  %v744_v23 = vmul.f32 %v740_v26, %v728_v8  ;;  %v844_v25 = vld [vmem:[#allocation7 + $0x31] ss:$8 sm:$0x3]  ;;  %v892_v8 = vld [vmem:[#allocation7 + $0x33] ss:$8 sm:$0x3] }
 0x12e   : > { %v849_v53 = vrot.slane %v844_v25, %v2136_v56  ;;  %v2405_v32 = vld [vmem:[#allocation7 + $0x34] ss:$8 sm:$0x3]  ;;  %v853_v63 = vrot.slane %v844_v25, %v2138_v57  ;;  %v2451_v25 = vld [vmem:[#allocation7 + $0x40] ss:$8 sm:$0x3] }
 0x12f   : > { %v2271_v38 = vpop.permute.xlu1 %749  ;;  %v2273_v39 = vpop.permute.xlu0 %747  ;;  %v745_v2 = vadd.f32 %v743_v20, %v721_v27 }
 0x130   : > { %v752_v15 = vsel %vm751_vm6, %v2273_v39, %v2271_v38  ;;  %v753_v17 = vsel %vm751_vm6, %v2271_v38, %v2273_v39  ;;  %v812_v39 = vrot.slane %v803_v7, %v2138_v57  ;;  %vm1152_vm6 = vcmp.lt.s32.totalorder %v2099_v35, 96 }
 0x131   : > { %v767_v60 = vmul.f32 %v760_v28, %v753_v17  ;;  %v768_v61 = vmul.f32 %v764_v30, %v752_v15  ;;  %v746_v28 = vadd.f32 %v744_v23, %v722_v59  ;;  %v2417_v15 = vld [vmem:[#allocation7 + $0x35] ss:$8 sm:$0x3]  ;;  %v897_v17 = vrot.slane %v892_v8, %v2136_v56 }
 0x132   : > { %v925_v23 = vrot.slane %v2405_v32, %v2138_v57  ;;  %v945_v49 = vrot.slane %v2417_v15, %v2136_v56  ;;  %v949_v27 = vrot.slane %v2417_v15, %v2138_v57 }
 0x133   : > { %v2275_v40 = vpop.permute.xlu1 %773  ;;  %v2277_v41 = vpop.permute.xlu0 %771  ;;  %v769_v4 = vadd.f32 %v767_v60, %v745_v2  ;;  %v770_v7 = vadd.f32 %v768_v61, %v746_v28  ;;  %v969_v60 = vrot.slane %v2424_v16, %v2136_v56  ;;  %v973_v61 = vrot.slane %v2424_v16, %v2138_v57 }
 0x134   : > { %v776_v24 = vsel %vm775_vm7, %v2277_v41, %v2275_v40  ;;  %v777_v38 = vsel %vm775_vm7, %v2275_v40, %v2277_v41  ;;  %v829_v40 = vrot.slane %v820_v12, %v2138_v57  ;;  %v877_v12 = vrot.slane %v868_v54, %v2138_v57 }
 0x135   : > { %v791_v29 = vmul.f32 %v784_v34, %v777_v38  ;;  %v792_v30 = vmul.f32 %v788_v9, %v776_v24  ;;  %v873_v34 = vrot.slane %v868_v54, %v2136_v56  ;;  %v2429_v24 = vld [vmem:[#allocation7 + $0x37] ss:$8 sm:$0x3]  ;;  %v2467_v54 = vld [vmem:[#allocation7 + $0x41] ss:$8 sm:$0x3] }
 0x136   : > { %v833_v13 = vmul.f32 %v829_v40, %v2041_v33  ;;  %v901_v33 = vrot.slane %v892_v8, %v2138_v57  ;;  %v997_v40 = vrot.slane %v2429_v24, %v2138_v57  ;;  %vm1176_vm7 = vcmp.lt.s32.totalorder %v2099_v35, 95 }
 0x137   : > { %v2279_v42 = vpop.permute.xlu1 %797  ;;  %v2281_v43 = vpop.permute.xlu0 %795  ;;  %v793_v14 = vadd.f32 %v791_v29, %v769_v4  ;;  %v794_v62 = vadd.f32 %v792_v30, %v770_v7 }
 0x138   : > { %v800_v26 = vsel %vm799_vm8, %v2281_v43, %v2279_v42  ;;  %v801_v0 = vsel %vm799_vm8, %v2279_v42, %v2281_v43  ;;  %vm1200_vm8 = vcmp.lt.s32.totalorder %v2099_v35, 94 }
 0x139   : > { %v815_v42 = vmul.f32 %v808_v36, %v801_v0  ;;  %v816_v43 = vmul.f32 %v812_v39, %v800_v26  ;;  %v921_v36 = vrot.slane %v2405_v32, %v2136_v56  ;;  %v993_v0 = vrot.slane %v2429_v24, %v2136_v56 }
 0x13a   : > { %v1041_v32 = vrot.slane %v2467_v54, %v2136_v56 }
 0x13b   : > { %v2283_v45 = vpop.permute.xlu1 %838  ;;  %v2285_v44 = vpop.permute.xlu0 %836  ;;  %v817_v19 = vadd.f32 %v815_v42, %v793_v14  ;;  %v818_v20 = vadd.f32 %v816_v43, %v794_v62  ;;  %v1021_v42 = vrot.slane %v2451_v25, %v2138_v57  ;;  %v2485_v43 = vld [vmem:[#allocation7 + $0x42] ss:$8 sm:$0x3] }
 0x13c   : > { %v841_v38 = vsel %vm840_vm9, %v2285_v44, %v2283_v45  ;;  %v842_v39 = vsel %vm840_vm9, %v2283_v45, %v2285_v44  ;;  %vm1224_vm9 = vcmp.lt.s32.totalorder %v2099_v35, 93 }
 0x13d   : > { %v834_v2 = vadd.f32 %v832_v3, %v817_v19  ;;  %v835_v28 = vadd.f32 %v833_v13, %v818_v20  ;;  %v856_v29 = vmul.f32 %v849_v53, %v841_v38  ;;  %v857_v30 = vmul.f32 %v853_v63, %v842_v39 }
 0x13e   : > { %v1045_v63 = vrot.slane %v2467_v54, %v2138_v57 }
 0x13f   : > { %v2287_v46 = vpop.permute.xlu1 %862  ;;  %v2289_v47 = vpop.permute.xlu0 %860  ;;  %v858_v13 = vadd.f32 %v856_v29, %v834_v2 }
 0x140   : > { %v865_v44 = vsel %vm864_vm10, %v2289_v47, %v2287_v46  ;;  %v866_v26 = vsel %vm864_vm10, %v2287_v46, %v2289_v47  ;;  %v1017_v47 = vrot.slane %v2451_v25, %v2136_v56  ;;  %vm1248_vm10 = vcmp.lt.s32.totalorder %v2099_v35, 83 }
 0x141   : > { %v880_v53 = vmul.f32 %v873_v34, %v865_v44  ;;  %v881_v7 = vmul.f32 %v877_v12, %v866_v26  ;;  %v859_v34 = vadd.f32 %v857_v30, %v835_v28  ;;  %v2502_v12 = vld [vmem:[#allocation7 + $0x43] ss:$8 sm:$0x3]  ;;  %v2519_v44 = vld [vmem:[#allocation7 + $0x44] ss:$8 sm:$0x3] }
 0x143   : > { %v2291_v50 = vpop.permute.xlu1 %886  ;;  %v2293_v51 = vpop.permute.xlu0 %884  ;;  %v882_v19 = vadd.f32 %v880_v53, %v858_v13  ;;  %v883_v20 = vadd.f32 %v881_v7, %v859_v34 }
 0x144   : > { %v889_v4 = vsel %vm888_vm11, %v2293_v51, %v2291_v50  ;;  %v890_v46 = vsel %vm888_vm11, %v2291_v50, %v2293_v51  ;;  %vm1272_vm11 = vcmp.lt.s32.totalorder %v2099_v35, 82 }
 0x145   : > { %v904_v14 = vmul.f32 %v897_v17, %v889_v4  ;;  %v905_v62 = vmul.f32 %v901_v33, %v890_v46  ;;  %v1069_v17 = vrot.slane %v2485_v43, %v2138_v57  ;;  %v2536_v4 = vld [vmem:[#allocation7 + $0x45] ss:$8 sm:$0x3] }
 0x146   : > { %v1137_v16 = vrot.slane %v2536_v4, %v2136_v56 }
 0x147   : > { %v2295_v52 = vpop.permute.xlu1 %910  ;;  %v2297_v55 = vpop.permute.xlu0 %908  ;;  %v906_v2 = vadd.f32 %v904_v14, %v882_v19  ;;  %v907_v28 = vadd.f32 %v905_v62, %v883_v20 }
 0x148   : > { %v913_v50 = vsel %vm912_vm12, %v2297_v55, %v2295_v52  ;;  %v914_v51 = vsel %vm912_vm12, %v2295_v52, %v2297_v55  ;;  %v1065_v55 = vrot.slane %v2485_v43, %v2136_v56  ;;  %vm1296_vm12 = vcmp.lt.s32.totalorder %v2099_v35, 81 }
 0x149   : > { %v928_v38 = vmul.f32 %v921_v36, %v913_v50  ;;  %v929_v39 = vmul.f32 %v925_v23, %v914_v51  ;;  %v1089_v36 = vrot.slane %v2502_v12, %v2136_v56  ;;  %v1093_v23 = vrot.slane %v2502_v12, %v2138_v57 }
 0x14b   : > { %v2299_v48 = vpop.permute.xlu1 %934  ;;  %v2301_v58 = vpop.permute.xlu0 %932  ;;  %v930_v53 = vadd.f32 %v928_v38, %v906_v2  ;;  %v931_v7 = vadd.f32 %v929_v39, %v907_v28 }
 0x14c   : > { %v937_v15 = vsel %vm936_vm13, %v2301_v58, %v2299_v48  ;;  %v938_v52 = vsel %vm936_vm13, %v2299_v48, %v2301_v58  ;;  %vm1320_vm13 = vcmp.lt.s32.totalorder %v2099_v35, 80 }
 0x14d   : > { %v952_v29 = vmul.f32 %v945_v49, %v937_v15  ;;  %v953_v30 = vmul.f32 %v949_v27, %v938_v52  ;;  %v1117_v49 = vrot.slane %v2519_v44, %v2138_v57  ;;  %v2582_v52 = vld [vmem:[#allocation7 + $0x47] ss:$8 sm:$0x3] }
 0x14e   : > { %v1189_v25 = vrot.slane %v2582_v52, %v2138_v57 }
 0x14f   : > { %v2309_v5 = vpop.permute.xlu1 %958  ;;  %v2311_v6 = vpop.permute.xlu0 %956  ;;  %v954_v34 = vadd.f32 %v952_v29, %v930_v53  ;;  %v955_v14 = vadd.f32 %v953_v30, %v931_v7  ;;  %v2642_v53 = vld [vmem:[#allocation7 + $0x51] ss:$8 sm:$0x3] }
 0x150   : > { %v961_v48 = vsel %vm960_vm14, %v2311_v6, %v2309_v5  ;;  %v962_v58 = vsel %vm960_vm14, %v2309_v5, %v2311_v6  ;;  %v1113_v6 = vrot.slane %v2519_v44, %v2136_v56  ;;  %vm1344_vm14 = vcmp.lt.s32.totalorder %v2099_v35, 79 }
 0x151   : > { %v976_v50 = vmul.f32 %v969_v60, %v961_v48  ;;  %v977_v51 = vmul.f32 %v973_v61, %v962_v58  ;;  %v1141_v61 = vrot.slane %v2536_v4, %v2138_v57 }
 0x153   : > { %v2323_v11 = vpop.permute.xlu1 %982  ;;  %v2325_v21 = vpop.permute.xlu0 %980  ;;  %v978_v19 = vadd.f32 %v976_v50, %v954_v34  ;;  %v979_v20 = vadd.f32 %v977_v51, %v955_v14 }
 0x154   : > { %v985_v46 = vsel %vm984_vm15, %v2325_v21, %v2323_v11  ;;  %v986_v5 = vsel %vm984_vm15, %v2323_v11, %v2325_v21  ;;  %v2559_v11 = vld [vmem:[#allocation7 + $0x46] ss:$8 sm:$0x3]  ;;  %vm1368_vm15 = vcmp.lt.s32.totalorder %v2099_v35, 78 }
 0x155   : > { %v1000_v62 = vmul.f32 %v993_v0, %v985_v46  ;;  %v1001_v15 = vmul.f32 %v997_v40, %v986_v5  ;;  %v1161_v0 = vrot.slane %v2559_v11, %v2136_v56  ;;  %v1165_v24 = vrot.slane %v2559_v11, %v2138_v57 }
 0x157   : > { %v2351_v10 = vpop.permute.xlu1 %1006  ;;  %v2353_v22 = vpop.permute.xlu0 %1004  ;;  %v1003_v2 = vadd.f32 %v1001_v15, %v979_v20 }
 0x158   : > { %v1009_v13 = vsel %vm1008_vm0, %v2353_v22, %v2351_v10  ;;  %v1010_v60 = vsel %vm1008_vm0, %v2351_v10, %v2353_v22  ;;  %vm1392_vm0 = vcmp.lt.s32.totalorder %v2099_v35, 77 }
 0x159   : > { %v1024_v38 = vmul.f32 %v1017_v47, %v1009_v13  ;;  %v1025_v39 = vmul.f32 %v1021_v42, %v1010_v60  ;;  %v1185_v47 = vrot.slane %v2582_v52, %v2136_v56  ;;  %v1002_v42 = vadd.f32 %v1000_v62, %v978_v19  ;;  %v2661_v13 = vld [vmem:[#allocation7 + $0x52] ss:$8 sm:$0x3] }
 0x15a   : > { %v1233_v60 = vrot.slane %v2642_v53, %v2136_v56  ;;  %v1261_v19 = vrot.slane %v2661_v13, %v2138_v57 }
 0x15b   : > { %v2375_v37 = vpop.permute.xlu1 %1030  ;;  %v2377_v18 = vpop.permute.xlu0 %1028  ;;  %v1026_v46 = vadd.f32 %v1024_v38, %v1002_v42  ;;  %v1027_v5 = vadd.f32 %v1025_v39, %v1003_v2 }
 0x15c   : > { %v1033_v10 = vsel %vm1032_vm1, %v2377_v18, %v2375_v37  ;;  %v1034_v22 = vsel %vm1032_vm1, %v2375_v37, %v2377_v18  ;;  %v2605_v37 = vld [vmem:[#allocation7 + $0x50] ss:$8 sm:$0x3] }
 0x15d   : > { %v1048_v28 = vmul.f32 %v1041_v32, %v1033_v10  ;;  %v1049_v29 = vmul.f32 %v1045_v63, %v1034_v22  ;;  %v1209_v30 = vrot.slane %v2605_v37, %v2136_v56  ;;  %v1276_v22 = vld [vmem:[#allocation7 + $0x53] ss:$8 sm:$0x3] }
 0x15f   : > { %v2398_v41 = vpop.permute.xlu1 %1054  ;;  %v2400_v1 = vpop.permute.xlu0 %1052  ;;  %v1050_v43 = vadd.f32 %v1048_v28, %v1026_v46 }
 0x160   : > { %v1057_v48 = vsel %vm1056_vm2, %v2400_v1, %v2398_v41  ;;  %v1058_v58 = vsel %vm1056_vm2, %v2398_v41, %v2400_v1 }
 0x161   : > { %v1072_v54 = vmul.f32 %v1065_v55, %v1057_v48  ;;  %v1073_v63 = vmul.f32 %v1069_v17, %v1058_v58  ;;  %v1213_v55 = vrot.slane %v2605_v37, %v2138_v57  ;;  %v1051_v17 = vadd.f32 %v1049_v29, %v1027_v5  ;;  %v1300_v37 = vld [vmem:[#allocation7 + $0x54] ss:$8 sm:$0x3] }
 0x162   : > { %v1281_v48 = vrot.slane %v1276_v22, %v2136_v56  ;;  %v1285_v58 = vrot.slane %v1276_v22, %v2138_v57 }
 0x163   : > { %v2411_v31 = vpop.permute.xlu1 %1078  ;;  %v2413_v9 = vpop.permute.xlu0 %1076  ;;  %v1075_v34 = vadd.f32 %v1073_v63, %v1051_v17  ;;  %v1309_v63 = vrot.slane %v1300_v37, %v2138_v57 }
 0x164   : > { %v1081_v41 = vsel %vm1080_vm3, %v2413_v9, %v2411_v31  ;;  %v1082_v1 = vsel %vm1080_vm3, %v2411_v31, %v2413_v9 }
 0x165   : > { %v1096_v50 = vmul.f32 %v1089_v36, %v1081_v41  ;;  %v1097_v51 = vmul.f32 %v1093_v23, %v1082_v1  ;;  %v1237_v36 = vrot.slane %v2642_v53, %v2138_v57  ;;  %v1074_v23 = vadd.f32 %v1072_v54, %v1050_v43  ;;  %v1324_v54 = vld [vmem:[#allocation7 + $0x55] ss:$8 sm:$0x3] }
 0x166   : > { %v1305_v41 = vrot.slane %v1300_v37, %v2136_v56  ;;  %v1329_v17 = vrot.slane %v1324_v54, %v2136_v56 }
 0x167   : > { %v2443_v59 = vpop.permute.xlu1 %1102  ;;  %v2453_v45 = vpop.permute.xlu0 %1100  ;;  %v1098_v52 = vadd.f32 %v1096_v50, %v1074_v23  ;;  %v1099_v10 = vadd.f32 %v1097_v51, %v1075_v34  ;;  %v1333_v50 = vrot.slane %v1324_v54, %v2138_v57 }
 0x168   : > { %v1105_v31 = vsel %vm1104_vm4, %v2453_v45, %v2443_v59  ;;  %v1106_v9 = vsel %vm1104_vm4, %v2443_v59, %v2453_v45 }
 0x169   : > { %v1120_v14 = vmul.f32 %v1113_v6, %v1105_v31  ;;  %v1121_v62 = vmul.f32 %v1117_v49, %v1106_v9  ;;  %v1257_v6 = vrot.slane %v2661_v13, %v2136_v56  ;;  %v1348_v9 = vld [vmem:[#allocation7 + $0x56] ss:$8 sm:$0x3] }
 0x16a   : > { %v1353_v23 = vrot.slane %v1348_v9, %v2136_v56 }
 0x16b   : > { %v2480_v3 = vpop.permute.xlu1 %1126  ;;  %v2487_v8 = vpop.permute.xlu0 %1124  ;;  %v1123_v4 = vadd.f32 %v1121_v62, %v1099_v10  ;;  %v1357_v10 = vrot.slane %v1348_v9, %v2138_v57 }
 0x16c   : > { %v1129_v59 = vsel %vm1128_vm5, %v2487_v8, %v2480_v3  ;;  %v1130_v45 = vsel %vm1128_vm5, %v2480_v3, %v2487_v8 }
 0x16d   : > { %v1144_v44 = vmul.f32 %v1137_v16, %v1129_v59  ;;  %v1145_v49 = vmul.f32 %v1141_v61, %v1130_v45  ;;  %v1122_v16 = vadd.f32 %v1120_v14, %v1098_v52 }
 0x16f   : > { %v2516_v33 = vpop.permute.xlu1 %1150  ;;  %v2521_v26 = vpop.permute.xlu0 %1148  ;;  %v1146_v42 = vadd.f32 %v1144_v44, %v1122_v16 }
 0x170   : > { %v1153_v3 = vsel %vm1152_vm6, %v2521_v26, %v2516_v33  ;;  %v1154_v8 = vsel %vm1152_vm6, %v2516_v33, %v2521_v26 }
 0x171   : > { %v1168_v61 = vmul.f32 %v1161_v0, %v1153_v3  ;;  %v1169_v38 = vmul.f32 %v1165_v24, %v1154_v8  ;;  %v1147_v0 = vadd.f32 %v1145_v49, %v1123_v4  ;;  %v1372_v3 = vld [vmem:[#allocation7 + $0x57] ss:$8 sm:$0x3] }
 0x172   : > { %v1377_v16 = vrot.slane %v1372_v3, %v2136_v56  ;;  %v1381_v4 = vrot.slane %v1372_v3, %v2138_v57 }
 0x173   : > { %v2550_v27 = vpop.permute.xlu1 %1174  ;;  %v2561_v21 = vpop.permute.xlu0 %1172 }
 0x174   : > { %v1177_v33 = vsel %vm1176_vm7, %v2561_v21, %v2550_v27  ;;  %v1178_v26 = vsel %vm1176_vm7, %v2550_v27, %v2561_v21 }
 0x175   : > { %v1192_v2 = vmul.f32 %v1185_v47, %v1177_v33  ;;  %v1193_v28 = vmul.f32 %v1189_v25, %v1178_v26 }
 0x177   : > { %v2596_v40 = vpop.permute.xlu1 %1198  ;;  %v1197_v18 = vpop.permute.xlu0 %1196 }
 0x178   : > { %v1201_v27 = vsel %vm1200_vm8, %v1197_v18, %v2596_v40  ;;  %v1202_v21 = vsel %vm1200_vm8, %v2596_v40, %v1197_v18  ;;  %v1170_v40 = vadd.f32 %v1168_v61, %v1146_v42  ;;  %v1171_v18 = vadd.f32 %v1169_v38, %v1147_v0 }
 0x179   : > { %v1216_v1 = vmul.f32 %v1209_v30, %v1201_v27  ;;  %v1217_v46 = vmul.f32 %v1213_v55, %v1202_v21  ;;  %v1396_v27 = vld [vmem:[#allocation7 + $0x60] ss:$8 sm:$0x3] }
 0x17a   : > { %v1195_v53 = vadd.f32 %v1193_v28, %v1171_v18 }
 0x17b   : > { %v1223_v32 = vpop.permute.xlu1 %1222  ;;  %v1221_v7 = vpop.permute.xlu0 %1220 }
 0x17c   : > { %v1225_v11 = vsel %vm1224_vm9, %v1221_v7, %v1223_v32  ;;  %v1226_v24 = vsel %vm1224_vm9, %v1223_v32, %v1221_v7  ;;  %v1194_v32 = vadd.f32 %v1192_v2, %v1170_v40  ;;  %v1219_v13 = vadd.f32 %v1217_v46, %v1195_v53 }
 0x17d   : > { %v1240_v7 = vmul.f32 %v1233_v60, %v1225_v11  ;;  %v1241_v31 = vmul.f32 %v1237_v36, %v1226_v24  ;;  %v1401_v24 = vrot.slane %v1396_v27, %v2136_v56 }
 0x17e   : > { %v1218_v51 = vadd.f32 %v1216_v1, %v1194_v32 }
 0x17f   : > { %v1247_v12 = vpop.permute.xlu1 %1246  ;;  %v1243_v14 = vadd.f32 %v1241_v31, %v1219_v13 }
 0x180   : > { %v1245_v15 = vpop.permute.xlu0 %1244  ;;  %v1242_v34 = vadd.f32 %v1240_v7, %v1218_v51 }
 0x181   : > { %v1249_v47 = vsel %vm1248_vm10, %v1245_v15, %v1247_v12  ;;  %v1250_v25 = vsel %vm1248_vm10, %v1247_v12, %v1245_v15 }
 0x182   : > { %v1264_v59 = vmul.f32 %v1257_v6, %v1249_v47  ;;  %v1265_v45 = vmul.f32 %v1261_v19, %v1250_v25 }
 0x183   : > { %v1271_v20 = vpop.permute.xlu1 %1270 }
 0x184   : > { %v1269_v39 = vpop.permute.xlu0 %1268  ;;  %v1266_v44 = vadd.f32 %v1264_v59, %v1242_v34  ;;  %v1267_v49 = vadd.f32 %v1265_v45, %v1243_v14 }
 0x185   : > { %v1273_v30 = vsel %vm1272_vm11, %v1269_v39, %v1271_v20  ;;  %v1274_v55 = vsel %vm1272_vm11, %v1271_v20, %v1269_v39 }
 0x186   : > { %v1288_v62 = vmul.f32 %v1281_v48, %v1273_v30  ;;  %v1289_v15 = vmul.f32 %v1285_v58, %v1274_v55 }
 0x187   : > { %v1295_v29 = vpop.permute.xlu1 %1294 }
 0x188   : > { %v1293_v5 = vpop.permute.xlu0 %1292  ;;  %v1290_v61 = vadd.f32 %v1288_v62, %v1266_v44  ;;  %v1291_v38 = vadd.f32 %v1289_v15, %v1267_v49 }
 0x189   : > { %v1297_v60 = vsel %vm1296_vm12, %v1293_v5, %v1295_v29  ;;  %v1298_v36 = vsel %vm1296_vm12, %v1295_v29, %v1293_v5  ;;  %v1405_v29 = vrot.slane %v1396_v27, %v2138_v57 }
 0x18a   : > { %v1312_v22 = vmul.f32 %v1305_v41, %v1297_v60  ;;  %v1313_v33 = vmul.f32 %v1309_v63, %v1298_v36 }
 0x18b   : > { %v1319_v43 = vpop.permute.xlu1 %1318 }
 0x18c   : > { %v1317_v12 = vpop.permute.xlu0 %1316  ;;  %v1314_v48 = vadd.f32 %v1312_v22, %v1290_v61  ;;  %v1315_v58 = vadd.f32 %v1313_v33, %v1291_v38 }
 0x18d   : > { %v1321_v8 = vsel %vm1320_vm13, %v1317_v12, %v1319_v43  ;;  %v1322_v6 = vsel %vm1320_vm13, %v1319_v43, %v1317_v12 }
 0x18e   : > { %v1336_v39 = vmul.f32 %v1329_v17, %v1321_v8  ;;  %v1337_v37 = vmul.f32 %v1333_v50, %v1322_v6 }
 0x18f   : > { %v1343_v52 = vpop.permute.xlu1 %1342 }
 0x190   : > { %v1341_v26 = vpop.permute.xlu0 %1340  ;;  %v1338_v41 = vadd.f32 %v1336_v39, %v1314_v48  ;;  %v1339_v40 = vadd.f32 %v1337_v37, %v1315_v58 }
 0x191   : > { %v1345_v19 = vsel %vm1344_vm14, %v1341_v26, %v1343_v52  ;;  %v1346_v20 = vsel %vm1344_vm14, %v1343_v52, %v1341_v26  ;;  %v1677_v52 = vld [vmem:[%s2026_s6] sm:$0xff]  ;;  %s1742_s6 = scalar_lea.vmem %s1741_s30, 256 }
 0x192   : > { %v1360_v42 = vmul.f32 %v1353_v23, %v1345_v19  ;;  %v1361_v0 = vmul.f32 %v1357_v10, %v1346_v20  ;;  %p1744_p13 = scmp.lt.s32.totalorder %s1742_s6, %s1736_s9 }
 0x193   : > { %v1367_v21 = vpop.permute.xlu1 %1366 }
 0x194   : > { %v1365_v2 = vpop.permute.xlu0 %1364  ;;  %v1362_v5 = vadd.f32 %v1360_v42, %v1338_v41  ;;  %v1363_v54 = vadd.f32 %v1361_v0, %v1339_v40  ;;  %p1745_p3 = por %p1744_p13, %p1743_p10 }
 0x195   : > { %v1369_v28 = vsel %vm1368_vm15, %v1365_v2, %v1367_v21  ;;  %v1370_v11 = vsel %vm1368_vm15, %v1367_v21, %v1365_v2 }
 0x196   : > { %v1384_v18 = vmul.f32 %v1377_v16, %v1369_v28  ;;  %v1385_v1 = vmul.f32 %v1381_v4, %v1370_v11  ;;  %p1746_p7 = pnand %p1745_p3, %p1739_p8 }
 0x197   : > { %v1391_v46 = vpop.permute.xlu1 %1390 }
 0x198   : > { %v1389_v47 = vpop.permute.xlu0 %1388  ;;  %v1386_v32 = vadd.f32 %v1384_v18, %v1362_v5  ;;  %v1387_v53 = vadd.f32 %v1385_v1, %v1363_v54 }
 0x199   : > { %v1393_v25 = vsel %vm1392_vm0, %v1389_v47, %v1391_v46  ;;  %v1394_v63 = vsel %vm1392_vm0, %v1391_v46, %v1389_v47 }
 0x19a   : > { %v1408_v7 = vmul.f32 %v1401_v24, %v1393_v25  ;;  %v1409_v31 = vmul.f32 %v1405_v29, %v1394_v63 }
 0x19c   : > { %v1410_v9 = vadd.f32 %v1408_v7, %v1386_v32  ;;  %v1411_v57 = vadd.f32 %v1409_v31, %v1387_v53 }
 0x19e   : > { %v1552_v30 = vclamps-f32 %v1410_v9, 30.0  ;;  %v1553_v55 = vclamps-f32 %v1411_v57, 30.0 }
 0x1a0   : > { %v1416_v43 = vsub.f32 0.0, %v1552_v30  ;;  %v1417_v17 = vsub.f32 0.0, %v1553_v55 }
 0x1a2   : > { %v1418_v50 = vmul.f32 1.442695, %v1416_v43  ;;  %v1420_v51 = vmul.f32 1.442695, %v1417_v17 }
 0x1a4   : > { %1669 = vpow2.f32 %v1418_v50 }
 0x1a5   : > { %1671 = vpow2.f32 %v1420_v51 }
 0x1ae   : > { %v1670_v13 = vpop.eup %1669 }
 0x1af   : > { %v1672_v59 = vpop.eup %1671  ;;  %v1422_v35 = vadd.f32 1.0, %v1670_v13 }
 0x1b0   : > { %v1423_v45 = vadd.f32 1.0, %v1672_v59 }
 0x1b1   : > { %1673 = vrcp.f32 %v1422_v35 }
 0x1b2   : > { %1675 = vrcp.f32 %v1423_v45 }
 0x1bb   : > { %v1674_v12 = vpop.eup %1673 }
 0x1bc   : > { %v1676_v60 = vpop.eup %1675  ;;  %v1426_v36 = vmul.f32 %v1674_v12, %v1422_v35 }
 0x1bd   : > { %v1427_v23 = vmul.f32 %v1676_v60, %v1423_v45 }
 0x1be   : > { %v1428_v34 = vsub.f32 2.0, %v1426_v36 }
 0x1bf   : > { %v1429_v14 = vsub.f32 2.0, %v1427_v23 }
 0x1c0   : > { %v1430_v62 = vmul.f32 %v1674_v12, %v1428_v34 }
 0x1c1   : > { %v1431_v15 = vmul.f32 %v1676_v60, %v1429_v14 }
 0x1c2   : > { %v1435_v3 = vrot.slane %v1430_v62, %v2136_v56 }
 0x1c3   : > { %v1439_v8 = vrot.slane %v1431_v15, %v2136_v56 }
 0x1c5   : > { %v1442_v6 = vcombine.low %v1435_v3, %v1439_v8 }
 0x1c7   : > { %v1444_v10 = vmul.f32 %v1677_v52, %v1442_v6 }
 0x1c9   : > { %1445 = vst [vmem:[%s202_s4] sm:$0xff] %v1444_v10 }
 0x1ca   : > { %1749 = shalt.err (!%p1746_p7)
}
 0x1cb   : > { %s1750_s24 = scalar_lea.hbm %s2779_s7, 128  ;;  %s1754_s12 = scalar_lea.hbm %s2826_s3, 256 }
 0x1cc   : > { %p1751_p9 = scmp.ne.s32.totalorder %s2779_s7, %s1750_s24  ;;  %p1755_p0 = scmp.lt.u32.totalorder %s2779_s7, %s2826_s3 }
 0x1cd   : > { %p1756_p11 = scmp.lt.u32.totalorder %s1754_s12, %s1750_s24  ;;  %p1758_p4 = scmp.lt.u32.totalorder %s1750_s24, %s2779_s7 }
 0x1ce   : > { %p1752_p2 = pnand %p1751_p9, %p1975_p12 }
 0x1cf   : > { %p1757_p1 = por %p1756_p11, %p1755_p0 }
 0x1d0   : > { %p1753_p5 = pneg %p1752_p2 }
 0x1d1   : > { %p1759_p6 = por %p1758_p4, %p1757_p1 }
 0x1d3   : > { %p1760_p8 = pnand %p1759_p6, %p1753_p5 }
 0x1d5   : > { %1763 = shalt.err (!%p1760_p8)
}
 0x1d6   : > { %1567 = dma.vmem_to_hbm [thread:$0]  (%p1975_p12), %s2781_s26, 128, %s2779_s7, %s1447_s8  }
 0x1d7 PF: > { %s1473_s29 = sand.u32 1, %s1794_s14   ;;  %p2841_p10 = scmp.ne.s32.totalorder %s2831_s20, 0 }
 0x1d8   : > { %p2842_p13 = scmp.ge.s32.totalorder %s1806_s17, 2  ;;  %s1474_s23 = scalar_lea.sflag [#allocation6], %s1473_s29 }
 0x1da   : > { %p1578_p3 = pnand %p2842_p13, %p2841_p10 }
 0x1dc   : > { %1789 = dma.done.wait (!%p1578_p3), %s1474_s23, 128  }
 0x1dd   : > { %1791 = vsyncadd (!%p1578_p3), %s1474_s23, 4294967168  ;;  %p18_p7 = scmp.ge.s32.totalorder %s1940_s25, 4   ;;  %s2843_s14 = smov %s1798_s15 }
 0x1de   : > { %s2844_s15 = smov %s1802_s16  ;;  %s2845_s16 = smov %s1971_s13 }
 0x1df   : > { %s2846_s17 = smov %s1940_s25  ;;  %20 = sbr.rel (!%p18_p7) target bundleno = 8 (0x8), region = 129 }
 0x1e6   :  { %1479 = vsyncpa [#allocation5], 1 }
 0x1e7   :  { %1481 = vsyncpa [#allocation5 + $0x1], 1 }
 0x1e8   :  { %1482 = vsyncpa [#allocation8], 1 }
 0x1e9   :  { %1483 = vsyncpa [#allocation6], 1 }
 0x1ea   :  { %1485 = vsyncpa [#allocation6 + $0x1], 1 }

</bundles_post_ra>
